<compile_context>
chip_gen: v6e
topology: v6e:2x2x1
jax: 0.10.0
libtpu: 0.0.40
codegen_flags: <defaults>
</compile_context>

<pallas_src>
import jax
import jax.numpy as jnp
from jax import lax
from jax.experimental import pallas as pl
from jax.experimental.pallas import tpu as pltpu

EPS = 1e-5  # default eps for nn.LayerNorm and F.layer_norm


# ------------------------- fused block kernel -----------------------------
def _make_kernel(H, W):
    P = W + 1  # halo rows on each side of the flattened (H*W) row axis

    def kernel(x_ref, vecs_ref, ws_ref, sel_ref, o_ref, p0_ref, p1_ref):
        # x_ref   : (1, N, C) input rows of one image
        # vecs_ref: (25, C) = [ln_g, ln_b, a1, b1, a2, b2, conv_b,
        #                      tap_w slot0 (9 rows), tap_w slot1 (9 rows)]
        # ws_ref  : (2, C, C) bf16 sign weights, ws[0]=sign(W1).T, ws[1]=sign(W2).T
        # sel_ref : (4, C, C) f32 0/1 selection matrices [S0y, S0z, S1y, S1z]
        # p0_ref/p1_ref: (N + 2P, C) f32 row-padded scratches for conv taps
        N, C = x_ref.shape[1], x_ref.shape[2]

        x = x_ref[0].astype(jnp.float32)                        # (N, C)

        # ---- norm2: LayerNorm over channels (affine) ----
        m = jnp.mean(x, axis=-1, keepdims=True)
        d = x - m
        v = jnp.mean(d * d, axis=-1, keepdims=True)
        xn = d * lax.rsqrt(v + EPS) * vecs_ref[0:1, :] + vecs_ref[1:2, :]
        # xn == x1 (residual source)

        # ---- fc1 / fc2: bf16 sign weights on MXU, f32 alpha post-scale ----
        # The row swap around fc2 in the PyTorch code cancels exactly
        # (fc2 is row-wise), so z = fc2(xn) directly.
        xb = xn.astype(jnp.bfloat16)
        y = jnp.dot(xb, ws_ref[0], preferred_element_type=jnp.float32)
        y = y * vecs_ref[2:3, :] + vecs_ref[3:4, :] + xn         # fc1 + x1
        z = jnp.dot(xb, ws_ref[1], preferred_element_type=jnp.float32)
        z = z * vecs_ref[4:5, :] + vecs_ref[5:6, :] + xn         # fc2 + x1

        # ---- DWConv1 spatial LayerNorm over (H, W) per channel, no affine ---
        # Per-channel, so the two concat halves normalize independently.
        def spatial_ln(t):
            mu = jnp.mean(t, axis=0, keepdims=True)
            dd = t - mu
            vv = jnp.mean(dd * dd, axis=0, keepdims=True)
            return dd * lax.rsqrt(vv + EPS)

        yl = spatial_ln(y)
        zl = spatial_ln(z)

        # ---- gather the per-group input pairs into per-slot planes ----
        # concat channel 2g   -> p0[:, g] ; concat channel 2g+1 -> p1[:, g]
        # (0/1 selection matmuls: exact, avoid stride-2 lane gathers)
        p0 = (jnp.dot(yl, sel_ref[0], preferred_element_type=jnp.float32)
              + jnp.dot(zl, sel_ref[1], preferred_element_type=jnp.float32))
        p1 = (jnp.dot(yl, sel_ref[2], preferred_element_type=jnp.float32)
              + jnp.dot(zl, sel_ref[3], preferred_element_type=jnp.float32))

        # Zero only the (W+1)-row halos (re-done each step: scratch is
        # per-core, batch axis is megacore-parallel), then write interiors.
        zero_halo = jnp.zeros((P, C), jnp.float32)
        p0_ref[0:P, :] = zero_halo
        p0_ref[P + N:, :] = zero_halo
        p1_ref[0:P, :] = zero_halo
        p1_ref[P + N:, :] = zero_halo
        p0_ref[P:P + N, :] = p0
        p1_ref[P:P + N, :] = p1

        # ---- grouped 3x3 conv as 9 shifted VPU multiply-adds ----
        # flattened row n = h*W + w; tap (di, dj) reads row n + di*W + dj of
        # the padded buffer; the W-edge wrap is killed with a column mask
        # (applied once per dj group).
        colw = lax.broadcasted_iota(jnp.int32, (N, 1), 0) % W
        mask_l = (colw >= 1).astype(jnp.float32)           # valid for dj = -1
        mask_r = (colw <= W - 2).astype(jnp.float32)       # valid for dj = +1

        acc = jnp.zeros((N, C), jnp.float32)
        for dj, mask in ((-1, mask_l), (0, None), (1, mask_r)):
            part = jnp.zeros((N, C), jnp.float32)
            for di in (-1, 0, 1):
                t = (di + 1) * 3 + (dj + 1)                # tap index 0..8
                base = P + di * W + dj
                part = part + p0_ref[base:base + N, :] * vecs_ref[7 + t:8 + t, :]
                part = part + p1_ref[base:base + N, :] * vecs_ref[16 + t:17 + t, :]
            if mask is not None:
                part = part * mask
            acc = acc + part

        # conv bias + x1 residual, then x = x + drop_path(x)  (DropPath = Id)
        out = acc + vecs_ref[6:7, :] + xn
        o_ref[0] = (out + out).astype(o_ref.dtype)

    return kernel


# ---------------------------- full forward --------------------------------
def ucm_block1_forward(x, H, W, params):
    B, N, C = x.shape
    assert N == H * W
    assert C % 2 == 0
    w1, b1 = params["fc1_w"], params["fc1_b"]          # (C, C), (C,)
    w2, b2 = params["fc2_w"], params["fc2_b"]
    wc, bc = params["conv_w"], params["conv_b"]         # (C, 2, 3, 3), (C,)
    assert w1.shape == (C, C) and w2.shape == (C, C)    # mlp_hidden_dim == dim

    # ---- XNOR binarization of the linear weights (host side, tiny) ----
    a1 = jnp.mean(jnp.abs(w1), axis=1)                  # per-output alpha
    a2 = jnp.mean(jnp.abs(w2), axis=1)
    ws = jnp.stack([jnp.sign(w1).T, jnp.sign(w2).T], axis=0).astype(jnp.bfloat16)

    # ---- XNOR binarization of the grouped 3x3 conv -> per-channel tap rows --
    ac = jnp.mean(jnp.abs(wc), axis=(1, 2, 3))           # (C,)
    wcb = jnp.sign(wc) * ac[:, None, None, None]         # (C, 2, 3, 3)
    wt = jnp.transpose(wcb, (1, 2, 3, 0)).reshape(2, 9, C)  # [slot, tap, g]

    # ---- 0/1 selection matrices: concat channels (2g, 2g+1) -> slot planes --
    half = C // 2
    g = jnp.arange(C)
    gl, gh = g[:half], g[half:]
    S = jnp.zeros((4, C, C), jnp.float32)
    S = S.at[0, 2 * gl, gl].set(1.0)                     # S0y: y[2g]     -> p0[g]
    S = S.at[1, 2 * gh - C, gh].set(1.0)                 # S0z: z[2g-C]   -> p0[g]
    S = S.at[2, 2 * gl + 1, gl].set(1.0)                 # S1y: y[2g+1]   -> p1[g]
    S = S.at[3, 2 * gh + 1 - C, gh].set(1.0)             # S1z: z[2g+1-C] -> p1[g]

    vecs = jnp.concatenate(
        [jnp.stack([params["norm2_w"], params["norm2_b"],
                    a1, b1, a2, b2, bc], axis=0),
         wt[0], wt[1]], axis=0).astype(jnp.float32)      # (25, C)

    P = W + 1
    kernel = _make_kernel(H, W)
    return pl.pallas_call(
        kernel,
        out_shape=jax.ShapeDtypeStruct((B, N, C), x.dtype),
        grid_spec=pltpu.PrefetchScalarGridSpec(
            num_scalar_prefetch=0,
            grid=(B,),
            in_specs=[
                pl.BlockSpec((1, N, C), lambda b: (b, 0, 0)),
                pl.BlockSpec((25, C), lambda b: (0, 0)),
                pl.BlockSpec((2, C, C), lambda b: (0, 0, 0)),
                pl.BlockSpec((4, C, C), lambda b: (0, 0, 0)),
            ],
            out_specs=pl.BlockSpec((1, N, C), lambda b: (b, 0, 0)),
            scratch_shapes=[pltpu.VMEM((N + 2 * P, C), jnp.float32),
                            pltpu.VMEM((N + 2 * P, C), jnp.float32)]),
        compiler_params=pltpu.CompilerParams(
            dimension_semantics=("parallel",)),
    )(x, vecs, ws, S)


# --------------------------- pure-JAX reference ----------------------------
def reference_forward(x, H, W, params):
    B, N, C = x.shape
    gamma, beta = params["norm2_w"], params["norm2_b"]
    w1, b1 = params["fc1_w"], params["fc1_b"]
    w2, b2 = params["fc2_w"], params["fc2_b"]
    wc, bc = params["conv_w"], params["conv_b"]

    def binarize(w, axes):
        a = jnp.mean(jnp.abs(w), axis=axes, keepdims=True)
        return jnp.sign(w) * a

    m = x.mean(-1, keepdims=True)
    v = ((x - m) ** 2).mean(-1, keepdims=True)
    xn = (x - m) / jnp.sqrt(v + EPS) * gamma + beta
    x1 = xn
    xf = xn.reshape(B * N, C)

    y = xf @ binarize(w1, (1,)).T + b1
    y = y.reshape(B, N, -1) + x1

    # faithful to the PyTorch code: swap rows 0 and B*N-1 around fc2
    x2 = xf.at[0].set(xf[-1]).at[-1].set(xf[0])
    z = x2 @ binarize(w2, (1,)).T + b2
    z = z.at[jnp.array([0, B * N - 1])].set(z[jnp.array([B * N - 1, 0])])
    z = z.reshape(B, N, -1) + x1

    cat = jnp.concatenate([y, z], axis=-1).reshape(B, H, W, 2 * C)
    mm = cat.mean(axis=(1, 2), keepdims=True)
    vv = ((cat - mm) ** 2).mean(axis=(1, 2), keepdims=True)
    cln = (cat - mm) / jnp.sqrt(vv + EPS)

    rhs = jnp.transpose(binarize(wc, (1, 2, 3)), (2, 3, 1, 0))  # HWIO
    conv = lax.conv_general_dilated(
        cln, rhs, window_strides=(1, 1), padding="SAME",
        dimension_numbers=("NHWC", "HWIO", "NHWC"),
        feature_group_count=C) + bc
    out = conv.reshape(B, N, C) + x1
    return out + out


if __name__ == "__main__":
    B, H, W = 2, 8, 8
    dim = 32                       # mlp_ratio = 1.0 -> mlp_hidden_dim == dim
    N = H * W

    key = jax.random.PRNGKey(0)
    ks = jax.random.split(key, 8)
    x = jax.random.normal(ks[0], (B, N, dim), jnp.float32)

    params = {
        "norm2_w": jnp.ones((dim,), jnp.float32),
        "norm2_b": jnp.zeros((dim,), jnp.float32),
        "fc1_w": 0.02 * jax.random.normal(ks[1], (dim, dim), jnp.float32),
        "fc1_b": 0.01 * jax.random.normal(ks[2], (dim,), jnp.float32),
        "fc2_w": 0.02 * jax.random.normal(ks[3], (dim, dim), jnp.float32),
        "fc2_b": 0.01 * jax.random.normal(ks[4], (dim,), jnp.float32),
        # conv init: normal(0, sqrt(2/fan_out)), fan_out = 3*3*dim//dim = 9
        "conv_w": (2.0 / 9.0) ** 0.5
                  * jax.random.normal(ks[5], (dim, 2, 3, 3), jnp.float32),
        "conv_b": 0.01 * jax.random.normal(ks[6], (dim,), jnp.float32),
    }

    out = jax.block_until_ready(ucm_block1_forward(x, H, W, params))
    ref = reference_forward(x, H, W, params)
    assert out.shape == (B, N, dim)
    err = float(jnp.max(jnp.abs(out - ref)))
    assert err < 1e-2, f"max abs err {err}"
    print("KERNEL_OK")
</pallas_src>

<mosaic_0001>
module attributes {stable_mosaic.version = 11 : i64} {
  func.func @kernel(%arg0: i32, %arg1: memref<1x64x32xf32, #tpu.memory_space<vmem>>, %arg2: memref<25x32xf32, #tpu.memory_space<vmem>>, %arg3: memref<2x32x32xbf16, #tpu.memory_space<vmem>>, %arg4: memref<4x32x32xf32, #tpu.memory_space<vmem>>, %arg5: memref<1x64x32xf32, #tpu.memory_space<vmem>>, %arg6: memref<82x32xf32, #tpu.memory_space<vmem>>, %arg7: memref<82x32xf32, #tpu.memory_space<vmem>>) attributes {dimension_semantics = [#tpu.dimension_semantics<parallel>], iteration_bounds = array<i64: 2>, scalar_prefetch = 0 : i64, scratch_operands = 2 : i64, tpu.core_type = #tpu.core_type<tc>, window_params = [{transform_indices = @transform_0, window_bounds = array<i64: 1, 64, 32>}, {pipeline_mode = #tpu.pipeline_mode<synchronous>, transform_indices = @transform_1, window_bounds = array<i64: 25, 32>}, {pipeline_mode = #tpu.pipeline_mode<synchronous>, transform_indices = @transform_2, window_bounds = array<i64: 2, 32, 32>}, {pipeline_mode = #tpu.pipeline_mode<synchronous>, transform_indices = @transform_3, window_bounds = array<i64: 4, 32, 32>}, {transform_indices = @transform_4, window_bounds = array<i64: 1, 64, 32>}]} {
    %c0 = arith.constant 0 : index
    %c0_0 = arith.constant 0 : index
    %c0_1 = arith.constant 0 : index
    %0 = vector.load %arg1[%c0, %c0_0, %c0_1] : memref<1x64x32xf32, #tpu.memory_space<vmem>>, vector<1x64x32xf32>
    %1 = vector.shape_cast %0 : vector<1x64x32xf32> to vector<64x32xf32>
    %cst = arith.constant dense<0.000000e+00> : vector<64xf32>
    %2 = vector.multi_reduction <add>, %1, %cst [1] : vector<64x32xf32> to vector<64xf32>
    %3 = vector.shape_cast %2 : vector<64xf32> to vector<64x1xf32>
    %cst_2 = arith.constant 3.200000e+01 : f32
    %4 = vector.broadcast %cst_2 : f32 to vector<64x1xf32>
    %5 = arith.divf %3, %4 : vector<64x1xf32>
    %6 = vector.broadcast %5 : vector<64x1xf32> to vector<64x32xf32>
    %7 = arith.subf %1, %6 : vector<64x32xf32>
    %8 = arith.mulf %7, %7 : vector<64x32xf32>
    %cst_3 = arith.constant dense<0.000000e+00> : vector<64xf32>
    %9 = vector.multi_reduction <add>, %8, %cst_3 [1] : vector<64x32xf32> to vector<64xf32>
    %10 = vector.shape_cast %9 : vector<64xf32> to vector<64x1xf32>
    %cst_4 = arith.constant 3.200000e+01 : f32
    %11 = vector.broadcast %cst_4 : f32 to vector<64x1xf32>
    %12 = arith.divf %10, %11 : vector<64x1xf32>
    %cst_5 = arith.constant 9.99999974E-6 : f32
    %13 = vector.broadcast %cst_5 : f32 to vector<64x1xf32>
    %14 = arith.addf %12, %13 : vector<64x1xf32>
    %15 = math.rsqrt %14 : vector<64x1xf32>
    %16 = vector.broadcast %15 : vector<64x1xf32> to vector<64x32xf32>
    %17 = arith.mulf %7, %16 : vector<64x32xf32>
    %c0_6 = arith.constant 0 : index
    %c0_7 = arith.constant 0 : index
    %18 = vector.load %arg2[%c0_6, %c0_7] : memref<25x32xf32, #tpu.memory_space<vmem>>, vector<1x32xf32>
    %19 = vector.broadcast %18 : vector<1x32xf32> to vector<64x32xf32>
    %20 = arith.mulf %17, %19 : vector<64x32xf32>
    %c1 = arith.constant 1 : index
    %c0_8 = arith.constant 0 : index
    %21 = vector.load %arg2[%c1, %c0_8] : memref<25x32xf32, #tpu.memory_space<vmem>>, vector<1x32xf32>
    %22 = vector.broadcast %21 : vector<1x32xf32> to vector<64x32xf32>
    %23 = arith.addf %20, %22 : vector<64x32xf32>
    %24 = arith.truncf %23 : vector<64x32xf32> to vector<64x32xbf16>
    %c0_9 = arith.constant 0 : index
    %c0_10 = arith.constant 0 : index
    %c0_11 = arith.constant 0 : index
    %25 = vector.load %arg3[%c0_9, %c0_10, %c0_11] : memref<2x32x32xbf16, #tpu.memory_space<vmem>>, vector<1x32x32xbf16>
    %26 = vector.shape_cast %25 : vector<1x32x32xbf16> to vector<32x32xbf16>
    %cst_12 = arith.constant dense<0.000000e+00> : vector<64x32xf32>
    %27 = tpu.matmul %24, %26, %cst_12 {dimension_numbers = #tpu.dot_dimension_numbers<[1], [0], [0], [1], [0, 0, 1, 1], [], []>} : vector<64x32xbf16>, vector<32x32xbf16>, vector<64x32xf32> -> vector<64x32xf32>
    %c2 = arith.constant 2 : index
    %c0_13 = arith.constant 0 : index
    %28 = vector.load %arg2[%c2, %c0_13] : memref<25x32xf32, #tpu.memory_space<vmem>>, vector<1x32xf32>
    %29 = vector.broadcast %28 : vector<1x32xf32> to vector<64x32xf32>
    %30 = arith.mulf %27, %29 : vector<64x32xf32>
    %c3 = arith.constant 3 : index
    %c0_14 = arith.constant 0 : index
    %31 = vector.load %arg2[%c3, %c0_14] : memref<25x32xf32, #tpu.memory_space<vmem>>, vector<1x32xf32>
    %32 = vector.broadcast %31 : vector<1x32xf32> to vector<64x32xf32>
    %33 = arith.addf %30, %32 : vector<64x32xf32>
    %34 = arith.addf %33, %23 : vector<64x32xf32>
    %c1_15 = arith.constant 1 : index
    %c0_16 = arith.constant 0 : index
    %c0_17 = arith.constant 0 : index
    %35 = vector.load %arg3[%c1_15, %c0_16, %c0_17] : memref<2x32x32xbf16, #tpu.memory_space<vmem>>, vector<1x32x32xbf16>
    %36 = vector.shape_cast %35 : vector<1x32x32xbf16> to vector<32x32xbf16>
    %cst_18 = arith.constant dense<0.000000e+00> : vector<64x32xf32>
    %37 = tpu.matmul %24, %36, %cst_18 {dimension_numbers = #tpu.dot_dimension_numbers<[1], [0], [0], [1], [0, 0, 1, 1], [], []>} : vector<64x32xbf16>, vector<32x32xbf16>, vector<64x32xf32> -> vector<64x32xf32>
    %c4 = arith.constant 4 : index
    %c0_19 = arith.constant 0 : index
    %38 = vector.load %arg2[%c4, %c0_19] : memref<25x32xf32, #tpu.memory_space<vmem>>, vector<1x32xf32>
    %39 = vector.broadcast %38 : vector<1x32xf32> to vector<64x32xf32>
    %40 = arith.mulf %37, %39 : vector<64x32xf32>
    %c5 = arith.constant 5 : index
    %c0_20 = arith.constant 0 : index
    %41 = vector.load %arg2[%c5, %c0_20] : memref<25x32xf32, #tpu.memory_space<vmem>>, vector<1x32xf32>
    %42 = vector.broadcast %41 : vector<1x32xf32> to vector<64x32xf32>
    %43 = arith.addf %40, %42 : vector<64x32xf32>
    %44 = arith.addf %43, %23 : vector<64x32xf32>
    %cst_21 = arith.constant dense<0.000000e+00> : vector<32xf32>
    %45 = vector.multi_reduction <add>, %34, %cst_21 [0] : vector<64x32xf32> to vector<32xf32>
    %46 = vector.shape_cast %45 : vector<32xf32> to vector<1x32xf32>
    %cst_22 = arith.constant 6.400000e+01 : f32
    %47 = vector.broadcast %cst_22 : f32 to vector<1x32xf32>
    %48 = arith.divf %46, %47 : vector<1x32xf32>
    %49 = vector.broadcast %48 : vector<1x32xf32> to vector<64x32xf32>
    %50 = arith.subf %34, %49 : vector<64x32xf32>
    %51 = arith.mulf %50, %50 : vector<64x32xf32>
    %cst_23 = arith.constant dense<0.000000e+00> : vector<32xf32>
    %52 = vector.multi_reduction <add>, %51, %cst_23 [0] : vector<64x32xf32> to vector<32xf32>
    %53 = vector.shape_cast %52 : vector<32xf32> to vector<1x32xf32>
    %cst_24 = arith.constant 6.400000e+01 : f32
    %54 = vector.broadcast %cst_24 : f32 to vector<1x32xf32>
    %55 = arith.divf %53, %54 : vector<1x32xf32>
    %cst_25 = arith.constant 9.99999974E-6 : f32
    %56 = vector.broadcast %cst_25 : f32 to vector<1x32xf32>
    %57 = arith.addf %55, %56 : vector<1x32xf32>
    %58 = math.rsqrt %57 : vector<1x32xf32>
    %59 = vector.broadcast %58 : vector<1x32xf32> to vector<64x32xf32>
    %60 = arith.mulf %50, %59 : vector<64x32xf32>
    %cst_26 = arith.constant dense<0.000000e+00> : vector<32xf32>
    %61 = vector.multi_reduction <add>, %44, %cst_26 [0] : vector<64x32xf32> to vector<32xf32>
    %62 = vector.shape_cast %61 : vector<32xf32> to vector<1x32xf32>
    %cst_27 = arith.constant 6.400000e+01 : f32
    %63 = vector.broadcast %cst_27 : f32 to vector<1x32xf32>
    %64 = arith.divf %62, %63 : vector<1x32xf32>
    %65 = vector.broadcast %64 : vector<1x32xf32> to vector<64x32xf32>
    %66 = arith.subf %44, %65 : vector<64x32xf32>
    %67 = arith.mulf %66, %66 : vector<64x32xf32>
    %cst_28 = arith.constant dense<0.000000e+00> : vector<32xf32>
    %68 = vector.multi_reduction <add>, %67, %cst_28 [0] : vector<64x32xf32> to vector<32xf32>
    %69 = vector.shape_cast %68 : vector<32xf32> to vector<1x32xf32>
    %cst_29 = arith.constant 6.400000e+01 : f32
    %70 = vector.broadcast %cst_29 : f32 to vector<1x32xf32>
    %71 = arith.divf %69, %70 : vector<1x32xf32>
    %cst_30 = arith.constant 9.99999974E-6 : f32
    %72 = vector.broadcast %cst_30 : f32 to vector<1x32xf32>
    %73 = arith.addf %71, %72 : vector<1x32xf32>
    %74 = math.rsqrt %73 : vector<1x32xf32>
    %75 = vector.broadcast %74 : vector<1x32xf32> to vector<64x32xf32>
    %76 = arith.mulf %66, %75 : vector<64x32xf32>
    %c0_31 = arith.constant 0 : index
    %c0_32 = arith.constant 0 : index
    %c0_33 = arith.constant 0 : index
    %77 = vector.load %arg4[%c0_31, %c0_32, %c0_33] : memref<4x32x32xf32, #tpu.memory_space<vmem>>, vector<1x32x32xf32>
    %78 = vector.shape_cast %77 : vector<1x32x32xf32> to vector<32x32xf32>
    %cst_34 = arith.constant dense<0.000000e+00> : vector<64x32xf32>
    %79 = tpu.matmul %60, %78, %cst_34 {dimension_numbers = #tpu.dot_dimension_numbers<[1], [0], [0], [1], [0, 0, 1, 1], [], []>} : vector<64x32xf32>, vector<32x32xf32>, vector<64x32xf32> -> vector<64x32xf32>
    %c1_35 = arith.constant 1 : index
    %c0_36 = arith.constant 0 : index
    %c0_37 = arith.constant 0 : index
    %80 = vector.load %arg4[%c1_35, %c0_36, %c0_37] : memref<4x32x32xf32, #tpu.memory_space<vmem>>, vector<1x32x32xf32>
    %81 = vector.shape_cast %80 : vector<1x32x32xf32> to vector<32x32xf32>
    %cst_38 = arith.constant dense<0.000000e+00> : vector<64x32xf32>
    %82 = tpu.matmul %76, %81, %cst_38 {dimension_numbers = #tpu.dot_dimension_numbers<[1], [0], [0], [1], [0, 0, 1, 1], [], []>} : vector<64x32xf32>, vector<32x32xf32>, vector<64x32xf32> -> vector<64x32xf32>
    %83 = arith.addf %79, %82 : vector<64x32xf32>
    %c2_39 = arith.constant 2 : index
    %c0_40 = arith.constant 0 : index
    %c0_41 = arith.constant 0 : index
    %84 = vector.load %arg4[%c2_39, %c0_40, %c0_41] : memref<4x32x32xf32, #tpu.memory_space<vmem>>, vector<1x32x32xf32>
    %85 = vector.shape_cast %84 : vector<1x32x32xf32> to vector<32x32xf32>
    %cst_42 = arith.constant dense<0.000000e+00> : vector<64x32xf32>
    %86 = tpu.matmul %60, %85, %cst_42 {dimension_numbers = #tpu.dot_dimension_numbers<[1], [0], [0], [1], [0, 0, 1, 1], [], []>} : vector<64x32xf32>, vector<32x32xf32>, vector<64x32xf32> -> vector<64x32xf32>
    %c3_43 = arith.constant 3 : index
    %c0_44 = arith.constant 0 : index
    %c0_45 = arith.constant 0 : index
    %87 = vector.load %arg4[%c3_43, %c0_44, %c0_45] : memref<4x32x32xf32, #tpu.memory_space<vmem>>, vector<1x32x32xf32>
    %88 = vector.shape_cast %87 : vector<1x32x32xf32> to vector<32x32xf32>
    %cst_46 = arith.constant dense<0.000000e+00> : vector<64x32xf32>
    %89 = tpu.matmul %76, %88, %cst_46 {dimension_numbers = #tpu.dot_dimension_numbers<[1], [0], [0], [1], [0, 0, 1, 1], [], []>} : vector<64x32xf32>, vector<32x32xf32>, vector<64x32xf32> -> vector<64x32xf32>
    %90 = arith.addf %86, %89 : vector<64x32xf32>
    %cst_47 = arith.constant 0.000000e+00 : f32
    %91 = vector.broadcast %cst_47 : f32 to vector<9x32xf32>
    %c0_48 = arith.constant 0 : index
    %c0_49 = arith.constant 0 : index
    %92 = vector.load %arg6[%c0_48, %c0_49] : memref<82x32xf32, #tpu.memory_space<vmem>>, vector<9x32xf32>
    tpu.vector_store %arg6[%c0_48, %c0_49], %91 {strides = array<i32>} : memref<82x32xf32, #tpu.memory_space<vmem>>, vector<9x32xf32>,
    %c73 = arith.constant 73 : index
    %c0_50 = arith.constant 0 : index
    %93 = vector.load %arg6[%c73, %c0_50] : memref<82x32xf32, #tpu.memory_space<vmem>>, vector<9x32xf32>
    tpu.vector_store %arg6[%c73, %c0_50], %91 {strides = array<i32>} : memref<82x32xf32, #tpu.memory_space<vmem>>, vector<9x32xf32>,
    %c0_51 = arith.constant 0 : index
    %c0_52 = arith.constant 0 : index
    %94 = vector.load %arg7[%c0_51, %c0_52] : memref<82x32xf32, #tpu.memory_space<vmem>>, vector<9x32xf32>
    tpu.vector_store %arg7[%c0_51, %c0_52], %91 {strides = array<i32>} : memref<82x32xf32, #tpu.memory_space<vmem>>, vector<9x32xf32>,
    %c73_53 = arith.constant 73 : index
    %c0_54 = arith.constant 0 : index
    %95 = vector.load %arg7[%c73_53, %c0_54] : memref<82x32xf32, #tpu.memory_space<vmem>>, vector<9x32xf32>
    tpu.vector_store %arg7[%c73_53, %c0_54], %91 {strides = array<i32>} : memref<82x32xf32, #tpu.memory_space<vmem>>, vector<9x32xf32>,
    %c9 = arith.constant 9 : index
    %c0_55 = arith.constant 0 : index
    %96 = vector.load %arg6[%c9, %c0_55] : memref<82x32xf32, #tpu.memory_space<vmem>>, vector<64x32xf32>
    tpu.vector_store %arg6[%c9, %c0_55], %83 {strides = array<i32>} : memref<82x32xf32, #tpu.memory_space<vmem>>, vector<64x32xf32>,
    %c9_56 = arith.constant 9 : index
    %c0_57 = arith.constant 0 : index
    %97 = vector.load %arg7[%c9_56, %c0_57] : memref<82x32xf32, #tpu.memory_space<vmem>>, vector<64x32xf32>
    tpu.vector_store %arg7[%c9_56, %c0_57], %90 {strides = array<i32>} : memref<82x32xf32, #tpu.memory_space<vmem>>, vector<64x32xf32>,
    %98 = tpu.iota {dimensions = array<i32: 0>} : vector<64x1xi32>
    %c8_i32 = arith.constant 8 : i32
    %c0_i32 = arith.constant 0 : i32
    %99 = arith.cmpi eq, %c8_i32, %c0_i32 : i32
    %c1_i32 = arith.constant 1 : i32
    %100 = arith.select %99, %c1_i32, %c8_i32 : i32
    %101 = vector.broadcast %100 : i32 to vector<64x1xi32>
    %102 = arith.remsi %98, %101 : vector<64x1xi32>
    %c0_i32_58 = arith.constant 0 : i32
    %103 = vector.broadcast %c0_i32_58 : i32 to vector<64x1xi32>
    %104 = arith.cmpi ne, %102, %103 : vector<64x1xi32>
    %c0_i32_59 = arith.constant 0 : i32
    %105 = vector.broadcast %c0_i32_59 : i32 to vector<64x1xi32>
    %106 = arith.cmpi slt, %102, %105 : vector<64x1xi32>
    %c0_i32_60 = arith.constant 0 : i32
    %107 = arith.cmpi slt, %100, %c0_i32_60 : i32
    %108 = vector.broadcast %107 : i1 to vector<64x1xi1>
    %109 = vector.broadcast %108 : vector<64x1xi1> to vector<64x1xi1>
    %110 = arith.xori %106, %109 : vector<64x1xi1>
    %111 = arith.andi %110, %104 : vector<64x1xi1>
    %112 = vector.broadcast %100 : i32 to vector<64x1xi32>
    %113 = arith.addi %102, %112 : vector<64x1xi32>
    %114 = arith.select %111, %113, %102 : vector<64x1xi1>, vector<64x1xi32>
    %c1_i32_61 = arith.constant 1 : i32
    %115 = vector.broadcast %c1_i32_61 : i32 to vector<64x1xi32>
    %116 = arith.cmpi sge, %114, %115 : vector<64x1xi32>
    %117 = arith.extui %116 : vector<64x1xi1> to vector<64x1xi32>
    %118 = arith.sitofp %117 : vector<64x1xi32> to vector<64x1xf32>
    %c6_i32 = arith.constant 6 : i32
    %119 = vector.broadcast %c6_i32 : i32 to vector<64x1xi32>
    %120 = arith.cmpi sle, %114, %119 : vector<64x1xi32>
    %121 = arith.extui %120 : vector<64x1xi1> to vector<64x1xi32>
    %122 = arith.sitofp %121 : vector<64x1xi32> to vector<64x1xf32>
    %cst_62 = arith.constant 0.000000e+00 : f32
    %123 = vector.broadcast %cst_62 : f32 to vector<64x32xf32>
    %cst_63 = arith.constant 0.000000e+00 : f32
    %124 = vector.broadcast %cst_63 : f32 to vector<64x32xf32>
    %c0_64 = arith.constant 0 : index
    %c0_65 = arith.constant 0 : index
    %125 = vector.load %arg6[%c0_64, %c0_65] : memref<82x32xf32, #tpu.memory_space<vmem>>, vector<64x32xf32>
    %c7 = arith.constant 7 : index
    %c0_66 = arith.constant 0 : index
    %126 = vector.load %arg2[%c7, %c0_66] : memref<25x32xf32, #tpu.memory_space<vmem>>, vector<1x32xf32>
    %127 = vector.broadcast %126 : vector<1x32xf32> to vector<64x32xf32>
    %128 = arith.mulf %125, %127 : vector<64x32xf32>
    %129 = arith.addf %124, %128 : vector<64x32xf32>
    %c0_67 = arith.constant 0 : index
    %c0_68 = arith.constant 0 : index
    %130 = vector.load %arg7[%c0_67, %c0_68] : memref<82x32xf32, #tpu.memory_space<vmem>>, vector<64x32xf32>
    %c16 = arith.constant 16 : index
    %c0_69 = arith.constant 0 : index
    %131 = vector.load %arg2[%c16, %c0_69] : memref<25x32xf32, #tpu.memory_space<vmem>>, vector<1x32xf32>
    %132 = vector.broadcast %131 : vector<1x32xf32> to vector<64x32xf32>
    %133 = arith.mulf %130, %132 : vector<64x32xf32>
    %134 = arith.addf %129, %133 : vector<64x32xf32>
    %c8 = arith.constant 8 : index
    %c0_70 = arith.constant 0 : index
    %135 = vector.load %arg6[%c8, %c0_70] : memref<82x32xf32, #tpu.memory_space<vmem>>, vector<64x32xf32>
    %c10 = arith.constant 10 : index
    %c0_71 = arith.constant 0 : index
    %136 = vector.load %arg2[%c10, %c0_71] : memref<25x32xf32, #tpu.memory_space<vmem>>, vector<1x32xf32>
    %137 = vector.broadcast %136 : vector<1x32xf32> to vector<64x32xf32>
    %138 = arith.mulf %135, %137 : vector<64x32xf32>
    %139 = arith.addf %134, %138 : vector<64x32xf32>
    %c8_72 = arith.constant 8 : index
    %c0_73 = arith.constant 0 : index
    %140 = vector.load %arg7[%c8_72, %c0_73] : memref<82x32xf32, #tpu.memory_space<vmem>>, vector<64x32xf32>
    %c19 = arith.constant 19 : index
    %c0_74 = arith.constant 0 : index
    %141 = vector.load %arg2[%c19, %c0_74] : memref<25x32xf32, #tpu.memory_space<vmem>>, vector<1x32xf32>
    %142 = vector.broadcast %141 : vector<1x32xf32> to vector<64x32xf32>
    %143 = arith.mulf %140, %142 : vector<64x32xf32>
    %144 = arith.addf %139, %143 : vector<64x32xf32>
    %c16_75 = arith.constant 16 : index
    %c0_76 = arith.constant 0 : index
    %145 = vector.load %arg6[%c16_75, %c0_76] : memref<82x32xf32, #tpu.memory_space<vmem>>, vector<64x32xf32>
    %c13 = arith.constant 13 : index
    %c0_77 = arith.constant 0 : index
    %146 = vector.load %arg2[%c13, %c0_77] : memref<25x32xf32, #tpu.memory_space<vmem>>, vector<1x32xf32>
    %147 = vector.broadcast %146 : vector<1x32xf32> to vector<64x32xf32>
    %148 = arith.mulf %145, %147 : vector<64x32xf32>
    %149 = arith.addf %144, %148 : vector<64x32xf32>
    %c16_78 = arith.constant 16 : index
    %c0_79 = arith.constant 0 : index
    %150 = vector.load %arg7[%c16_78, %c0_79] : memref<82x32xf32, #tpu.memory_space<vmem>>, vector<64x32xf32>
    %c22 = arith.constant 22 : index
    %c0_80 = arith.constant 0 : index
    %151 = vector.load %arg2[%c22, %c0_80] : memref<25x32xf32, #tpu.memory_space<vmem>>, vector<1x32xf32>
    %152 = vector.broadcast %151 : vector<1x32xf32> to vector<64x32xf32>
    %153 = arith.mulf %150, %152 : vector<64x32xf32>
    %154 = arith.addf %149, %153 : vector<64x32xf32>
    %155 = vector.broadcast %118 : vector<64x1xf32> to vector<64x32xf32>
    %156 = arith.mulf %154, %155 : vector<64x32xf32>
    %157 = arith.addf %123, %156 : vector<64x32xf32>
    %cst_81 = arith.constant 0.000000e+00 : f32
    %158 = vector.broadcast %cst_81 : f32 to vector<64x32xf32>
    %c1_82 = arith.constant 1 : index
    %c0_83 = arith.constant 0 : index
    %159 = vector.load %arg6[%c1_82, %c0_83] : memref<82x32xf32, #tpu.memory_space<vmem>>, vector<64x32xf32>
    %c8_84 = arith.constant 8 : index
    %c0_85 = arith.constant 0 : index
    %160 = vector.load %arg2[%c8_84, %c0_85] : memref<25x32xf32, #tpu.memory_space<vmem>>, vector<1x32xf32>
    %161 = vector.broadcast %160 : vector<1x32xf32> to vector<64x32xf32>
    %162 = arith.mulf %159, %161 : vector<64x32xf32>
    %163 = arith.addf %158, %162 : vector<64x32xf32>
    %c1_86 = arith.constant 1 : index
    %c0_87 = arith.constant 0 : index
    %164 = vector.load %arg7[%c1_86, %c0_87] : memref<82x32xf32, #tpu.memory_space<vmem>>, vector<64x32xf32>
    %c17 = arith.constant 17 : index
    %c0_88 = arith.constant 0 : index
    %165 = vector.load %arg2[%c17, %c0_88] : memref<25x32xf32, #tpu.memory_space<vmem>>, vector<1x32xf32>
    %166 = vector.broadcast %165 : vector<1x32xf32> to vector<64x32xf32>
    %167 = arith.mulf %164, %166 : vector<64x32xf32>
    %168 = arith.addf %163, %167 : vector<64x32xf32>
    %c9_89 = arith.constant 9 : index
    %c0_90 = arith.constant 0 : index
    %169 = vector.load %arg6[%c9_89, %c0_90] : memref<82x32xf32, #tpu.memory_space<vmem>>, vector<64x32xf32>
    %c11 = arith.constant 11 : index
    %c0_91 = arith.constant 0 : index
    %170 = vector.load %arg2[%c11, %c0_91] : memref<25x32xf32, #tpu.memory_space<vmem>>, vector<1x32xf32>
    %171 = vector.broadcast %170 : vector<1x32xf32> to vector<64x32xf32>
    %172 = arith.mulf %169, %171 : vector<64x32xf32>
    %173 = arith.addf %168, %172 : vector<64x32xf32>
    %c9_92 = arith.constant 9 : index
    %c0_93 = arith.constant 0 : index
    %174 = vector.load %arg7[%c9_92, %c0_93] : memref<82x32xf32, #tpu.memory_space<vmem>>, vector<64x32xf32>
    %c20 = arith.constant 20 : index
    %c0_94 = arith.constant 0 : index
    %175 = vector.load %arg2[%c20, %c0_94] : memref<25x32xf32, #tpu.memory_space<vmem>>, vector<1x32xf32>
    %176 = vector.broadcast %175 : vector<1x32xf32> to vector<64x32xf32>
    %177 = arith.mulf %174, %176 : vector<64x32xf32>
    %178 = arith.addf %173, %177 : vector<64x32xf32>
    %c17_95 = arith.constant 17 : index
    %c0_96 = arith.constant 0 : index
    %179 = vector.load %arg6[%c17_95, %c0_96] : memref<82x32xf32, #tpu.memory_space<vmem>>, vector<64x32xf32>
    %c14 = arith.constant 14 : index
    %c0_97 = arith.constant 0 : index
    %180 = vector.load %arg2[%c14, %c0_97] : memref<25x32xf32, #tpu.memory_space<vmem>>, vector<1x32xf32>
    %181 = vector.broadcast %180 : vector<1x32xf32> to vector<64x32xf32>
    %182 = arith.mulf %179, %181 : vector<64x32xf32>
    %183 = arith.addf %178, %182 : vector<64x32xf32>
    %c17_98 = arith.constant 17 : index
    %c0_99 = arith.constant 0 : index
    %184 = vector.load %arg7[%c17_98, %c0_99] : memref<82x32xf32, #tpu.memory_space<vmem>>, vector<64x32xf32>
    %c23 = arith.constant 23 : index
    %c0_100 = arith.constant 0 : index
    %185 = vector.load %arg2[%c23, %c0_100] : memref<25x32xf32, #tpu.memory_space<vmem>>, vector<1x32xf32>
    %186 = vector.broadcast %185 : vector<1x32xf32> to vector<64x32xf32>
    %187 = arith.mulf %184, %186 : vector<64x32xf32>
    %188 = arith.addf %183, %187 : vector<64x32xf32>
    %189 = arith.addf %157, %188 : vector<64x32xf32>
    %cst_101 = arith.constant 0.000000e+00 : f32
    %190 = vector.broadcast %cst_101 : f32 to vector<64x32xf32>
    %c2_102 = arith.constant 2 : index
    %c0_103 = arith.constant 0 : index
    %191 = vector.load %arg6[%c2_102, %c0_103] : memref<82x32xf32, #tpu.memory_space<vmem>>, vector<64x32xf32>
    %c9_104 = arith.constant 9 : index
    %c0_105 = arith.constant 0 : index
    %192 = vector.load %arg2[%c9_104, %c0_105] : memref<25x32xf32, #tpu.memory_space<vmem>>, vector<1x32xf32>
    %193 = vector.broadcast %192 : vector<1x32xf32> to vector<64x32xf32>
    %194 = arith.mulf %191, %193 : vector<64x32xf32>
    %195 = arith.addf %190, %194 : vector<64x32xf32>
    %c2_106 = arith.constant 2 : index
    %c0_107 = arith.constant 0 : index
    %196 = vector.load %arg7[%c2_106, %c0_107] : memref<82x32xf32, #tpu.memory_space<vmem>>, vector<64x32xf32>
    %c18 = arith.constant 18 : index
    %c0_108 = arith.constant 0 : index
    %197 = vector.load %arg2[%c18, %c0_108] : memref<25x32xf32, #tpu.memory_space<vmem>>, vector<1x32xf32>
    %198 = vector.broadcast %197 : vector<1x32xf32> to vector<64x32xf32>
    %199 = arith.mulf %196, %198 : vector<64x32xf32>
    %200 = arith.addf %195, %199 : vector<64x32xf32>
    %c10_109 = arith.constant 10 : index
    %c0_110 = arith.constant 0 : index
    %201 = vector.load %arg6[%c10_109, %c0_110] : memref<82x32xf32, #tpu.memory_space<vmem>>, vector<64x32xf32>
    %c12 = arith.constant 12 : index
    %c0_111 = arith.constant 0 : index
    %202 = vector.load %arg2[%c12, %c0_111] : memref<25x32xf32, #tpu.memory_space<vmem>>, vector<1x32xf32>
    %203 = vector.broadcast %202 : vector<1x32xf32> to vector<64x32xf32>
    %204 = arith.mulf %201, %203 : vector<64x32xf32>
    %205 = arith.addf %200, %204 : vector<64x32xf32>
    %c10_112 = arith.constant 10 : index
    %c0_113 = arith.constant 0 : index
    %206 = vector.load %arg7[%c10_112, %c0_113] : memref<82x32xf32, #tpu.memory_space<vmem>>, vector<64x32xf32>
    %c21 = arith.constant 21 : index
    %c0_114 = arith.constant 0 : index
    %207 = vector.load %arg2[%c21, %c0_114] : memref<25x32xf32, #tpu.memory_space<vmem>>, vector<1x32xf32>
    %208 = vector.broadcast %207 : vector<1x32xf32> to vector<64x32xf32>
    %209 = arith.mulf %206, %208 : vector<64x32xf32>
    %210 = arith.addf %205, %209 : vector<64x32xf32>
    %c18_115 = arith.constant 18 : index
    %c0_116 = arith.constant 0 : index
    %211 = vector.load %arg6[%c18_115, %c0_116] : memref<82x32xf32, #tpu.memory_space<vmem>>, vector<64x32xf32>
    %c15 = arith.constant 15 : index
    %c0_117 = arith.constant 0 : index
    %212 = vector.load %arg2[%c15, %c0_117] : memref<25x32xf32, #tpu.memory_space<vmem>>, vector<1x32xf32>
    %213 = vector.broadcast %212 : vector<1x32xf32> to vector<64x32xf32>
    %214 = arith.mulf %211, %213 : vector<64x32xf32>
    %215 = arith.addf %210, %214 : vector<64x32xf32>
    %c18_118 = arith.constant 18 : index
    %c0_119 = arith.constant 0 : index
    %216 = vector.load %arg7[%c18_118, %c0_119] : memref<82x32xf32, #tpu.memory_space<vmem>>, vector<64x32xf32>
    %c24 = arith.constant 24 : index
    %c0_120 = arith.constant 0 : index
    %217 = vector.load %arg2[%c24, %c0_120] : memref<25x32xf32, #tpu.memory_space<vmem>>, vector<1x32xf32>
    %218 = vector.broadcast %217 : vector<1x32xf32> to vector<64x32xf32>
    %219 = arith.mulf %216, %218 : vector<64x32xf32>
    %220 = arith.addf %215, %219 : vector<64x32xf32>
    %221 = vector.broadcast %122 : vector<64x1xf32> to vector<64x32xf32>
    %222 = arith.mulf %220, %221 : vector<64x32xf32>
    %223 = arith.addf %189, %222 : vector<64x32xf32>
    %c6 = arith.constant 6 : index
    %c0_121 = arith.constant 0 : index
    %224 = vector.load %arg2[%c6, %c0_121] : memref<25x32xf32, #tpu.memory_space<vmem>>, vector<1x32xf32>
    %225 = vector.broadcast %224 : vector<1x32xf32> to vector<64x32xf32>
    %226 = arith.addf %223, %225 : vector<64x32xf32>
    %227 = arith.addf %226, %23 : vector<64x32xf32>
    %228 = arith.addf %227, %227 : vector<64x32xf32>
    %c0_122 = arith.constant 0 : index
    %c0_123 = arith.constant 0 : index
    %c0_124 = arith.constant 0 : index
    %229 = vector.load %arg5[%c0_122, %c0_123, %c0_124] : memref<1x64x32xf32, #tpu.memory_space<vmem>>, vector<1x64x32xf32>
    %230 = vector.shape_cast %229 : vector<1x64x32xf32> to vector<64x32xf32>
    %231 = vector.shape_cast %228 : vector<64x32xf32> to vector<1x64x32xf32>
    tpu.vector_store %arg5[%c0_122, %c0_123, %c0_124], %231 {strides = array<i32>} : memref<1x64x32xf32, #tpu.memory_space<vmem>>, vector<1x64x32xf32>,
    return
  }
  func.func @transform_0(%arg0: i32) -> (i32, i32, i32) {
    %c0_i32 = arith.constant 0 : i32
    %c0_i32_0 = arith.constant 0 : i32
    %c0_i32_1 = arith.constant 0 : i32
    return %arg0, %c0_i32, %c0_i32_0 : i32, i32, i32
  }
  func.func @transform_1(%arg0: i32) -> (i32, i32) {
    %c0_i32 = arith.constant 0 : i32
    %c0_i32_0 = arith.constant 0 : i32
    %c0_i32_1 = arith.constant 0 : i32
    return %c0_i32, %c0_i32_0 : i32, i32
  }
  func.func @transform_2(%arg0: i32) -> (i32, i32, i32) {
    %c0_i32 = arith.constant 0 : i32
    %c0_i32_0 = arith.constant 0 : i32
    %c0_i32_1 = arith.constant 0 : i32
    %c0_i32_2 = arith.constant 0 : i32
    return %c0_i32, %c0_i32_0, %c0_i32_1 : i32, i32, i32
  }
  func.func @transform_3(%arg0: i32) -> (i32, i32, i32) {
    %c0_i32 = arith.constant 0 : i32
    %c0_i32_0 = arith.constant 0 : i32
    %c0_i32_1 = arith.constant 0 : i32
    %c0_i32_2 = arith.constant 0 : i32
    return %c0_i32, %c0_i32_0, %c0_i32_1 : i32, i32, i32
  }
  func.func @transform_4(%arg0: i32) -> (i32, i32, i32) {
    %c0_i32 = arith.constant 0 : i32
    %c0_i32_0 = arith.constant 0 : i32
    %c0_i32_1 = arith.constant 0 : i32
    return %arg0, %c0_i32, %c0_i32_0 : i32, i32, i32
  }
}

</mosaic_0001>

<bundles_post_ra>
// kernel: tpu_custom_call.1
= control target key start
LH: loop header
LB: loop body
LE: loop exit
PB: predicated region body
PF: predicated region fallthrough
CT: control target
= control target key end

     0   :  { %s2307_s15 = smov 0   ;;  %s3461_s0 = inlined_call_operand.vmem [shape: f32[2,64,32], index: 0, kind: input, shape index: {}]   ;;  %s3462_s1 = inlined_call_operand.vmem [shape: f32[25,32], index: 1, kind: input, shape index: {}]   ;;  %s3463_s2 = inlined_call_operand.vmem [shape: bf16[2,32,32], index: 2, kind: input, shape index: {}]   ;;  %s3464_s3 = inlined_call_operand.vmem [shape: f32[4,32,32], index: 3, kind: input, shape index: {}]   ;;  %s3465_s4 = inlined_call_operand.vmem [shape: f32[2,64,32], index: 4, kind: output, shape index: {}]  }
   0x1 LB: > { %s1962_s16 = sadd.s32 4294967295, %s2279_s15   ;;  %p1966_p0 = scmp.ge.s32.totalorder %s2279_s15, 1  ;;  %s2279_s15 = sphi %s2307_s15, %s14_s15  }
   0x2   : > { %p162_p1 = scmp.lt.s32.totalorder %s2279_s15, 3 }
   0x4   : > { %p163_p2 = pnand %p1966_p0, %p162_p1 }
   0x6   : > { %166 = sbr.rel (%p163_p2) target bundleno = 931 (0x3a3), region = 36 }
   0xb   : > { %p188_p3 = scmp.lt.s32.totalorder %s1962_s16, 1  ;;  %vm207_vm0 = vcmask 261120   ;;  %v2249_v56 = vld [vmem:[%s3463_s2 + $0x8] sm:$0xff]   ;;  %v2250_v57 = vld [vmem:[%s3463_s2 + $0x18] sm:$0xff]   ;;  %v2251_v58 = vld [vmem:[%s3463_s2] sm:$0xff]   ;;  %vm1215_vm1 = vcmask 253952  }
   0xc   : > { %2136 = vmatprep.subr.bf16.mxu0 %v2249_v56  ;;  %2148 = vmatprep.subr.bf16.mxu1 %v2250_v57  ;;  %v2252_v59 = vld [vmem:[%s3463_s2 + $0x10] sm:$0xff]  }
   0xd   : > { %s3619_s16 = smov (!%p188_p3, %s1962_s16), 1  ;;  %2137 = vmatpush3.bf16.msra.mxu0 %v2249_v56  ;;  %2149 = vmatpush3.bf16.msra.mxu1 %v2250_v57 }
   0xe   : > { %s2074_s17 = sshll.u32 %s3619_s16, 6  ;;  %2138 = vmatprep.subr.bf16.mxu0 %v2251_v58  ;;  %2150 = vmatprep.subr.bf16.mxu1 %v2252_v59 }
   0xf   : > { %s192_s20 = scalar_lea.vmem %s3461_s0, %s2074_s17  ;;  %s3335_s21 = scalar_lea.vmem %s3465_s4, %s2074_s17 }
  0x10   : > { %v199_v0 = vld [vmem:[%s192_s20] sm:$0xff]  ;;  %v201_v1 = vld [vmem:[%s192_s20 + $0x10] sm:$0xff]  ;;  %v200_v2 = vld [vmem:[%s192_s20 + $0x8] sm:$0xff] }
  0x11   : > { %v208_v3 = vsel %vm207_vm0, %v199_v0, 0.0  ;;  %v214_v4 = vsel %vm207_vm0, %v201_v1, 0.0  ;;  %v202_v5 = vld [vmem:[%s192_s20 + $0x18] sm:$0xff]  ;;  %v211_v6 = vsel %vm207_vm0, %v200_v2, 0.0  ;;  %v203_v8 = vld [vmem:[%s192_s20 + $0x20] sm:$0xff]  ;;  %v204_v9 = vld [vmem:[%s192_s20 + $0x28] sm:$0xff]  ;;  %2139 = vmatpush3.bf16.msra.mxu0 %v2251_v58  ;;  %2151 = vmatpush3.bf16.msra.mxu1 %v2252_v59 }
  0x12   : > { %209 = vadd.xlane.f32.xlu0 %v208_v3  ;;  %215 = vadd.xlane.f32.xlu1 %v214_v4  ;;  %v217_v7 = vsel %vm207_vm0, %v202_v5, 0.0  ;;  %v220_v10 = vsel %vm207_vm0, %v203_v8, 0.0  ;;  %v223_v11 = vsel %vm207_vm0, %v204_v9, 0.0  ;;  %v205_v12 = vld [vmem:[%s192_s20 + $0x30] sm:$0xff]  ;;  %v206_v13 = vld [vmem:[%s192_s20 + $0x38] sm:$0xff] }
  0x13   : > { %v226_v14 = vsel %vm207_vm0, %v205_v12, 0.0  ;;  %v229_v15 = vsel %vm207_vm0, %v206_v13, 0.0  ;;  %v1996_v58 = vld [vmem:[%s3464_s3 + $0x38] sm:$0xff] }
  0x14   : > { %v730_v59 = vld [vmem:[%s3464_s3 + $0x18] sm:$0xff]  ;;  %2160 = vmatprep.subr.mxu0 %v1996_v58 }
  0x15   : > { %2180 = vmatprep.subr.mxu1 %v730_v59 }
  0x16   : > { %212 = vadd.xlane.f32.xlu0 %v211_v6  ;;  %218 = vadd.xlane.f32.xlu1 %v217_v7 }
  0x1a   : > { %221 = vadd.xlane.f32.xlu0 %v220_v10  ;;  %224 = vadd.xlane.f32.xlu1 %v223_v11 }
  0x1e   : > { %227 = vadd.xlane.f32.xlu0 %v226_v14  ;;  %230 = vadd.xlane.f32.xlu1 %v229_v15 }
  0x9b   : > { %v210_v16 = vpop.xlane.xlu0 %209  ;;  %v216_v17 = vpop.xlane.xlu1 %215 }
  0x9c   : > { %v233_v18 = vmul.f32 0.03125, %v210_v16  ;;  %v235_v19 = vmul.f32 0.03125, %v216_v17 }
  0x9e   : > { %v2331_v20 = vsub.f32 %v199_v0, %v233_v18  ;;  %v2333_v21 = vsub.f32 %v201_v1, %v235_v19 }
  0x9f   : > { %v213_v22 = vpop.xlane.xlu0 %212  ;;  %v219_v23 = vpop.xlane.xlu1 %218 }
  0xa0   : > { %v234_v24 = vmul.f32 0.03125, %v213_v22  ;;  %v236_v25 = vmul.f32 0.03125, %v219_v23  ;;  %v249_v26 = vmul.f32 %v2331_v20, %v2331_v20  ;;  %v251_v27 = vmul.f32 %v2333_v21, %v2333_v21 }
  0xa2   : > { %v2339_v28 = vsub.f32 %v200_v2, %v234_v24  ;;  %v2341_v29 = vsub.f32 %v202_v5, %v236_v25  ;;  %v257_v30 = vsel %vm207_vm0, %v249_v26, 0.0  ;;  %v263_v33 = vsel %vm207_vm0, %v251_v27, 0.0  ;;  %v1971_v24 = vld [vmem:[%s3462_s1] ss:$0 sm:$0xff] }
  0xa3   : > { %258 = vadd.xlane.f32.xlu0 %v257_v30  ;;  %v222_v31 = vpop.xlane.xlu0 %221  ;;  %v225_v32 = vpop.xlane.xlu1 %224 }
  0xa4   : > { %v237_v34 = vmul.f32 0.03125, %v222_v31  ;;  %v238_v35 = vmul.f32 0.03125, %v225_v32  ;;  %v250_v36 = vmul.f32 %v2339_v28, %v2339_v28  ;;  %v252_v37 = vmul.f32 %v2341_v29, %v2341_v29  ;;  %v1972_v32 = vld [vmem:[%s3462_s1 + $0x1] ss:$0 sm:$0xff] }
  0xa6   : > { %v2349_v38 = vsub.f32 %v203_v8, %v237_v34  ;;  %v2351_v39 = vsub.f32 %v204_v9, %v238_v35  ;;  %v260_v40 = vsel %vm207_vm0, %v250_v36, 0.0  ;;  %v266_v43 = vsel %vm207_vm0, %v252_v37, 0.0 }
  0xa7   : > { %264 = vadd.xlane.f32.xlu0 %v263_v33  ;;  %261 = vadd.xlane.f32.xlu1 %v260_v40  ;;  %v228_v41 = vpop.xlane.xlu0 %227  ;;  %v231_v42 = vpop.xlane.xlu1 %230 }
  0xa8   : > { %v239_v44 = vmul.f32 0.03125, %v228_v41  ;;  %v240_v45 = vmul.f32 0.03125, %v231_v42  ;;  %v253_v46 = vmul.f32 %v2349_v38, %v2349_v38  ;;  %v254_v47 = vmul.f32 %v2351_v39, %v2351_v39 }
  0xaa   : > { %v2359_v48 = vsub.f32 %v205_v12, %v239_v44  ;;  %v2361_v49 = vsub.f32 %v206_v13, %v240_v45  ;;  %v269_v50 = vsel %vm207_vm0, %v253_v46, 0.0  ;;  %v272_v51 = vsel %vm207_vm0, %v254_v47, 0.0 }
  0xab   : > { %267 = vadd.xlane.f32.xlu1 %v266_v43  ;;  %270 = vadd.xlane.f32.xlu0 %v269_v50 }
  0xac   : > { %v255_v52 = vmul.f32 %v2359_v48, %v2359_v48  ;;  %v256_v53 = vmul.f32 %v2361_v49, %v2361_v49 }
  0xae   : > { %v275_v54 = vsel %vm207_vm0, %v255_v52, 0.0  ;;  %v278_v55 = vsel %vm207_vm0, %v256_v53, 0.0 }
  0xaf   : > { %273 = vadd.xlane.f32.xlu1 %v272_v51  ;;  %276 = vadd.xlane.f32.xlu0 %v275_v54 }
  0xb3   : > { %279 = vadd.xlane.f32.xlu1 %v278_v55 }
 0x12c   : > { %v259_v60 = vpop.xlane.xlu0 %258 }
 0x12d   : > { %v281_v61 = vmul.f32 0.03125, %v259_v60  ;;  %v1995_v60 = vld [vmem:[%s3464_s3 + $0x30] sm:$0xff] }
 0x12f   : > { %v289_v62 = vadd.f32 1e-05, %v281_v61  ;;  %v729_v61 = vld [vmem:[%s3464_s3 + $0x10] sm:$0xff] }
 0x130   : > { %v262_v63 = vpop.xlane.xlu1 %261  ;;  %v265_v0 = vpop.xlane.xlu0 %264 }
 0x131   : > { %2253 = vrsqrt.f32 %v289_v62  ;;  %v282_v1 = vmul.f32 0.03125, %v262_v63  ;;  %v283_v2 = vmul.f32 0.03125, %v265_v0  ;;  %v1994_v62 = vld [vmem:[%s3464_s3 + $0x28] sm:$0xff]  ;;  %v1993_v0 = vld [vmem:[%s3464_s3 + $0x20] sm:$0xff] }
 0x132   : > { %v728_v63 = vld [vmem:[%s3464_s3 + $0x8] sm:$0xff] }
 0x133   : > { %v290_v3 = vadd.f32 1e-05, %v282_v1  ;;  %v291_v4 = vadd.f32 1e-05, %v283_v2  ;;  %v727_v1 = vld [vmem:[%s3464_s3] sm:$0xff]  ;;  %v2456_v2 = vld [vmem:[%s3464_s3 + $0x78] sm:$0xff] }
 0x134   : > { %v268_v5 = vpop.xlane.xlu1 %267  ;;  %v271_v6 = vpop.xlane.xlu0 %270 }
 0x135   : > { %2255 = vrsqrt.f32 %v290_v3  ;;  %v284_v7 = vmul.f32 0.03125, %v268_v5  ;;  %v285_v8 = vmul.f32 0.03125, %v271_v6  ;;  %v2461_v3 = vld [vmem:[%s3464_s3 + $0x58] sm:$0xff]  ;;  %v2473_v5 = vld [vmem:[%s3462_s1 + $0x4] ss:$0 sm:$0xff] }
 0x136   : > { %2257 = vrsqrt.f32 %v291_v4  ;;  %v2468_v4 = vld [vmem:[%s3462_s1 + $0x2] ss:$0 sm:$0xff] }
 0x137   : > { %v292_v9 = vadd.f32 1e-05, %v284_v7  ;;  %v293_v10 = vadd.f32 1e-05, %v285_v8 }
 0x138   : > { %v274_v11 = vpop.xlane.xlu1 %273  ;;  %v277_v12 = vpop.xlane.xlu0 %276 }
 0x139   : > { %2259 = vrsqrt.f32 %v292_v9  ;;  %v286_v13 = vmul.f32 0.03125, %v274_v11  ;;  %v287_v14 = vmul.f32 0.03125, %v277_v12  ;;  %v2480_v12 = vld [vmem:[%s3462_s1 + $0x3] ss:$0 sm:$0xff] }
 0x13a   : > { %2261 = vrsqrt.f32 %v293_v10 }
 0x13b   : > { %v294_v15 = vadd.f32 1e-05, %v286_v13  ;;  %v295_v16 = vadd.f32 1e-05, %v287_v14  ;;  %v2485_v13 = vld [vmem:[%s3462_s1 + $0x5] ss:$0 sm:$0xff] }
 0x13c   : > { %v280_v17 = vpop.xlane.xlu1 %279 }
 0x13d   : > { %2263 = vrsqrt.f32 %v294_v15  ;;  %v288_v18 = vmul.f32 0.03125, %v280_v17 }
 0x13e   : > { %v2254_v19 = vpop.eup %2253  ;;  %2265 = vrsqrt.f32 %v295_v16 }
 0x13f   : > { %v296_v22 = vadd.f32 1e-05, %v288_v18  ;;  %v305_v23 = vmul.f32 %v2254_v19, %v2331_v20 }
 0x141   : > { %2267 = vrsqrt.f32 %v296_v22  ;;  %v318_v30 = vmul.f32 %v1971_v24, %v305_v23 }
 0x142   : > { %v2256_v25 = vpop.eup %2255 }
 0x143   : > { %v2258_v26 = vpop.eup %2257  ;;  %v306_v27 = vmul.f32 %v2256_v25, %v2339_v28  ;;  %v2393_v36 = vadd.f32 %v1972_v32, %v318_v30 }
 0x144   : > { %v307_v31 = vmul.f32 %v2258_v26, %v2333_v21 }
 0x145   : > { %v319_v33 = vmul.f32 %v1971_v24, %v306_v27  ;;  %3474 = vst [vmem:[#allocation4_spill] sm:$0xff] %v2393_v36 }
 0x146   : > { %v2260_v34 = vpop.eup %2259  ;;  %v320_v40 = vmul.f32 %v1971_v24, %v307_v31 }
 0x147   : > { %v2262_v35 = vpop.eup %2261  ;;  %v308_v20 = vmul.f32 %v2260_v34, %v2341_v29  ;;  %v2395_v37 = vadd.f32 %v1972_v32, %v319_v33 }
 0x148   : > { %v309_v41 = vmul.f32 %v2262_v35, %v2349_v38  ;;  %v2403_v29 = vadd.f32 %v1972_v32, %v320_v40 }
 0x149   : > { %3475 = vst [vmem:[#allocation5_spill] sm:$0xff] %v2395_v37  ;;  %v339_v28 = vpack.c.bf16 %v2395_v37, %v2393_v36  ;;  %v321_v21 = vmul.f32 %v1971_v24, %v308_v20 }
 0x14a   : > { %v2264_v42 = vpop.eup %2263  ;;  %v322_v43 = vmul.f32 %v1971_v24, %v309_v41  ;;  %3476 = vst [vmem:[#allocation6_spill] sm:$0xff] %v2403_v29 }
 0x14b   : > { %v2266_v44 = vpop.eup %2265  ;;  %v310_v45 = vmul.f32 %v2264_v42, %v2351_v39  ;;  %2140 = vmatprep.mubr.msk.bf16.mxu0 %vm207_vm0, %v339_v28  ;;  %2152 = vmatprep.mubr.msk.bf16.mxu1 %vm207_vm0, %v339_v28  ;;  %v2405_v46 = vadd.f32 %v1972_v32, %v321_v21 }
 0x14c   : > { %v311_v47 = vmul.f32 %v2266_v44, %v2359_v48  ;;  %v2410_v52 = vadd.f32 %v1972_v32, %v322_v43 }
 0x14d   : > { %3477 = vst [vmem:[#allocation7_spill] sm:$0xff] %v2405_v46  ;;  %v340_v38 = vpack.c.bf16 %v2405_v46, %v2403_v29  ;;  %v323_v50 = vmul.f32 %v1971_v24, %v310_v45 }
 0x14e   : > { %v2268_v51 = vpop.eup %2267  ;;  %3478 = vst [vmem:[#allocation8_spill] sm:$0xff] %v2410_v52  ;;  %v324_v53 = vmul.f32 %v1971_v24, %v311_v47 }
 0x14f   : > { %v312_v39 = vmul.f32 %v2268_v51, %v2361_v49  ;;  %2141 = vmatmul.mubr.msk.bf16.vlgmr.msra.gmra.mxu0 %vm207_vm0, %v340_v38  ;;  %2153 = vmatmul.mubr.msk.bf16.vlgmr.msra.gmra.mxu1 %vm207_vm0, %v340_v38  ;;  %v2415_v54 = vadd.f32 %v1972_v32, %v323_v50 }
 0x150   : > { %v2421_v56 = vadd.f32 %v1972_v32, %v324_v53  ;;  %2161 = vmatpush3.msra.mxu0 %v1996_v58  ;;  %2181 = vmatpush3.msra.mxu1 %v730_v59 }
 0x151   : > { %3479 = vst [vmem:[#allocation9_spill] sm:$0xff] %v2415_v54  ;;  %v325_v55 = vmul.f32 %v1971_v24, %v312_v39  ;;  %v341_v48 = vpack.c.bf16 %v2415_v54, %v2410_v52  ;;  %2162 = vmatprep.subr.mxu0 %v1995_v60  ;;  %2182 = vmatprep.subr.mxu1 %v729_v61 }
 0x152   : > { %3480 = vst [vmem:[#allocation10_spill] sm:$0xff] %v2421_v56  ;;  %2163 = vmatpush3.msra.mxu0 %v1995_v60  ;;  %2183 = vmatpush3.msra.mxu1 %v729_v61 }
 0x153   : > { %2144 = vmatprep.mubr.msk.bf16.mxu0 %vm207_vm0, %v341_v48  ;;  %2156 = vmatprep.mubr.msk.bf16.mxu1 %vm207_vm0, %v341_v48  ;;  %v2423_v57 = vadd.f32 %v1972_v32, %v325_v55 }
 0x154   : > { %2164 = vmatprep.subr.mxu0 %v1994_v62  ;;  %2184 = vmatprep.subr.mxu1 %v728_v63 }
 0x155   : > { %3481 = vst [vmem:[#allocation11_spill] sm:$0xff] %v2423_v57  ;;  %v342_v49 = vpack.c.bf16 %v2423_v57, %v2421_v56  ;;  %2165 = vmatpush3.msra.mxu0 %v1994_v62  ;;  %2185 = vmatpush3.msra.mxu1 %v728_v63 }
 0x156   : > { %2166 = vmatprep.subr.mxu0 %v1993_v0  ;;  %2186 = vmatprep.subr.mxu1 %v727_v1 }
 0x157   : > { %2145 = vmatmul.mubr.msk.bf16.gmra.mxu0 %vm207_vm0, %v342_v49  ;;  %2157 = vmatmul.mubr.msk.bf16.gmra.mxu1 %vm207_vm0, %v342_v49 }
 0x158   : > { %2167 = vmatpush3.msra.mxu0 %v1993_v0  ;;  %2187 = vmatpush3.msra.mxu1 %v727_v1 }
 0x159   : > { %2200 = vmatprep.subr.mxu0 %v2456_v2  ;;  %2220 = vmatprep.subr.mxu1 %v2461_v3 }
 0x20f   : > { %v2142_v6 = vpop.f32.mrf.mxu0  ;;  %v2154_v7 = vpop.f32.mrf.mxu1 }
 0x210   : > { %v443_v8 = vmul.f32 %v2142_v6, %v2468_v4  ;;  %v559_v9 = vmul.f32 %v2154_v7, %v2473_v5 }
 0x211   : > { %v405_v10 = vpop.f32.mrf.mxu0  ;;  %v521_v11 = vpop.f32.mrf.mxu1 }
 0x212   : > { %v441_v14 = vmul.f32 %v2468_v4, %v405_v10  ;;  %v557_v15 = vmul.f32 %v2473_v5, %v521_v11  ;;  %v456_v22 = vadd.f32 %v2480_v12, %v443_v8  ;;  %v572_v23 = vadd.f32 %v2485_v13, %v559_v9 }
 0x213   : > { %v2143_v16 = vpop.f32.mrf.mxu0  ;;  %v2155_v17 = vpop.f32.mrf.mxu1 }
 0x214   : > { %v454_v18 = vadd.f32 %v2480_v12, %v441_v14  ;;  %v570_v19 = vadd.f32 %v2485_v13, %v557_v15  ;;  %v444_v24 = vmul.f32 %v2143_v16, %v2468_v4  ;;  %v560_v25 = vmul.f32 %v2155_v17, %v2473_v5 }
 0x215   : > { %v408_v26 = vpop.f32.mrf.mxu0  ;;  %v524_v27 = vpop.f32.mrf.mxu1  ;;  %v2506_v41 = vadd.f32 %v456_v22, %v2403_v29  ;;  %v2509_v28 = vadd.f32 %v572_v23, %v2403_v29 }
 0x216   : > { %v2496_v30 = vadd.f32 %v454_v18, %v2393_v36  ;;  %v2499_v31 = vadd.f32 %v570_v19, %v2393_v36  ;;  %v442_v32 = vmul.f32 %v2468_v4, %v408_v26  ;;  %v558_v33 = vmul.f32 %v2473_v5, %v524_v27 }
 0x217   : > { %v2146_v34 = vpop.f32.mrf.mxu0  ;;  %v2158_v35 = vpop.f32.mrf.mxu1  ;;  %v457_v20 = vadd.f32 %v2480_v12, %v444_v24  ;;  %v573_v40 = vadd.f32 %v2485_v13, %v560_v25  ;;  %v589_v8 = vsel %vm207_vm0, %v2506_v41, 0.0  ;;  %v660_v9 = vsel %vm207_vm0, %v2509_v28, 0.0 }
 0x218   : > { %v455_v21 = vadd.f32 %v2480_v12, %v442_v32  ;;  %v571_v42 = vadd.f32 %v2485_v13, %v558_v33  ;;  %v586_v45 = vsel %vm207_vm0, %v2496_v30, 0.0  ;;  %v657_v47 = vsel %vm207_vm0, %v2499_v31, 0.0 }
 0x219   : > { %v421_v43 = vpop.f32.mrf.mxu0  ;;  %v537_v44 = vpop.f32.mrf.mxu1  ;;  %v447_v39 = vmul.f32 %v2146_v34, %v2468_v4  ;;  %v563_v55 = vmul.f32 %v2158_v35, %v2473_v5  ;;  %v2528_v58 = vadd.f32 %v457_v20, %v2405_v46  ;;  %v2531_v59 = vadd.f32 %v573_v40, %v2405_v46 }
 0x21a   : > { %v445_v38 = vmul.f32 %v2468_v4, %v421_v43  ;;  %v561_v50 = vmul.f32 %v2473_v5, %v537_v44  ;;  %v2520_v51 = vadd.f32 %v455_v21, %v2395_v37  ;;  %v2523_v53 = vadd.f32 %v571_v42, %v2395_v37 }
 0x21b   : > { %v2147_v48 = vpop.f32.mrf.mxu0  ;;  %v2159_v49 = vpop.f32.mrf.mxu1  ;;  %v460_v14 = vadd.f32 %v2480_v12, %v447_v39  ;;  %v576_v15 = vadd.f32 %v2485_v13, %v563_v55  ;;  %v591_v24 = vsel %vm207_vm0, %v2528_v58, 0.0  ;;  %v662_v25 = vsel %vm207_vm0, %v2531_v59, 0.0 }
 0x21c   : > { %v458_v60 = vadd.f32 %v2480_v12, %v445_v38  ;;  %v574_v61 = vadd.f32 %v2485_v13, %v561_v50  ;;  %v587_v62 = vsel %vm207_vm0, %v2520_v51, 0.0  ;;  %v658_v63 = vsel %vm207_vm0, %v2523_v53, 0.0 }
 0x21d   : > { %v448_v0 = vmul.f32 %v2147_v48, %v2468_v4  ;;  %v564_v1 = vmul.f32 %v2159_v49, %v2473_v5  ;;  %v424_v6 = vpop.f32.mrf.mxu0  ;;  %v540_v7 = vpop.f32.mrf.mxu1  ;;  %v588_v10 = vadd.f32 %v587_v62, %v586_v45  ;;  %v659_v11 = vadd.f32 %v658_v63, %v657_v47 }
 0x21e   : > { %v2548_v16 = vadd.f32 %v458_v60, %v2410_v52  ;;  %v582_v17 = vadd.f32 %v574_v61, %v2410_v52  ;;  %v446_v22 = vmul.f32 %v2468_v4, %v424_v6  ;;  %v562_v23 = vmul.f32 %v2473_v5, %v540_v7 }
 0x21f   : > { %v590_v18 = vadd.f32 %v589_v8, %v588_v10  ;;  %v661_v19 = vadd.f32 %v660_v9, %v659_v11  ;;  %v461_v26 = vadd.f32 %v2480_v12, %v448_v0  ;;  %v577_v27 = vadd.f32 %v2485_v13, %v564_v1 }
 0x220   : > { %v459_v34 = vadd.f32 %v2480_v12, %v446_v22  ;;  %v575_v35 = vadd.f32 %v2485_v13, %v562_v23  ;;  %v2562_v4 = vadd.f32 %v460_v14, %v2421_v56  ;;  %v584_v5 = vadd.f32 %v576_v15, %v2421_v56 }
 0x221   : > { %v592_v32 = vadd.f32 %v591_v24, %v590_v18  ;;  %v663_v33 = vadd.f32 %v662_v25, %v661_v19  ;;  %v593_v20 = vsel %vm207_vm0, %v2548_v16, 0.0  ;;  %v664_v40 = vsel %vm207_vm0, %v582_v17, 0.0 }
 0x222   : > { %v467_v43 = vadd.f32 %v459_v34, %v2415_v54  ;;  %v583_v44 = vadd.f32 %v575_v35, %v2415_v54  ;;  %v2571_v12 = vadd.f32 %v461_v26, %v2423_v57  ;;  %v585_v13 = vadd.f32 %v577_v27, %v2423_v57 }
 0x223   : > { %v594_v21 = vadd.f32 %v593_v20, %v592_v32  ;;  %v665_v42 = vadd.f32 %v664_v40, %v663_v33  ;;  %v597_v39 = vsel %vm207_vm0, %v2562_v4, 0.0  ;;  %v668_v55 = vsel %vm207_vm0, %v584_v5, 0.0 }
 0x224   : > { %v595_v45 = vsel %vm207_vm0, %v467_v43, 0.0  ;;  %v666_v47 = vsel %vm207_vm0, %v583_v44, 0.0  ;;  %v599_v60 = vsel %vm207_vm0, %v2571_v12, 0.0  ;;  %v670_v61 = vsel %vm207_vm0, %v585_v13, 0.0 }
 0x225   : > { %v596_v38 = vadd.f32 %v595_v45, %v594_v21  ;;  %v667_v50 = vadd.f32 %v666_v47, %v665_v42 }
 0x227   : > { %v598_v48 = vadd.f32 %v597_v39, %v596_v38  ;;  %v669_v49 = vadd.f32 %v668_v55, %v667_v50 }
 0x229   : > { %v600_v62 = vadd.f32 %v599_v60, %v598_v48  ;;  %v671_v63 = vadd.f32 %v670_v61, %v669_v49 }
 0x22b   : > { %v601_v0 = vrot.slane %v600_v62, 4  ;;  %v672_v1 = vrot.slane %v671_v63, 4 }
 0x22d   : > { %v602_v6 = vadd.f32 %v601_v0, %v600_v62  ;;  %v673_v7 = vadd.f32 %v672_v1, %v671_v63 }
 0x22f   : > { %v603_v8 = vrot.slane %v602_v6, 2  ;;  %v674_v9 = vrot.slane %v673_v7, 2 }
 0x231   : > { %v604_v10 = vadd.f32 %v603_v8, %v602_v6  ;;  %v675_v11 = vadd.f32 %v674_v9, %v673_v7 }
 0x233   : > { %v676_v14 = vrot.slane %v675_v11, 1  ;;  %v605_v15 = vrot.slane %v604_v10, 1 }
 0x235   : > { %v677_v18 = vadd.f32 %v676_v14, %v675_v11  ;;  %v606_v22 = vadd.f32 %v605_v15, %v604_v10 }
 0x237   : > { %v678_v19 = vmul.f32 0.015625, %v677_v18  ;;  %v608_v33 = vmul.f32 0.015625, %v606_v22 }
 0x239   : > { %v2583_v23 = vsub.f32 %v2499_v31, %v678_v19  ;;  %v2586_v24 = vsub.f32 %v2523_v53, %v678_v19  ;;  %v2589_v25 = vsub.f32 %v2509_v28, %v678_v19  ;;  %v2592_v26 = vsub.f32 %v2531_v59, %v678_v19 }
 0x23a   : > { %v2594_v27 = vsub.f32 %v582_v17, %v678_v19  ;;  %v2602_v53 = vsub.f32 %v583_v44, %v678_v19  ;;  %v2608_v35 = vsub.f32 %v584_v5, %v678_v19  ;;  %v2614_v42 = vsub.f32 %v2496_v30, %v608_v33 }
 0x23b   : > { %v687_v32 = vmul.f32 %v2583_v23, %v2583_v23  ;;  %v688_v34 = vmul.f32 %v2586_v24, %v2586_v24  ;;  %v689_v31 = vmul.f32 %v2589_v25, %v2589_v25  ;;  %v690_v28 = vmul.f32 %v2592_v26, %v2592_v26 }
 0x23c   : > { %v691_v20 = vmul.f32 %v2594_v27, %v2594_v27  ;;  %v2617_v44 = vsub.f32 %v2520_v51, %v608_v33  ;;  %v2620_v45 = vsub.f32 %v2506_v41, %v608_v33  ;;  %v2623_v47 = vsub.f32 %v2528_v58, %v608_v33 }
 0x23d   : > { %v695_v59 = vsel %vm207_vm0, %v687_v32, 0.0  ;;  %v696_v17 = vsel %vm207_vm0, %v688_v34, 0.0  ;;  %v698_v21 = vsel %vm207_vm0, %v689_v31, 0.0  ;;  %v692_v5 = vmul.f32 %v2602_v53, %v2602_v53 }
 0x23e   : > { %v697_v40 = vadd.f32 %v696_v17, %v695_v59  ;;  %v2627_v38 = vsub.f32 %v585_v13, %v678_v19  ;;  %v700_v39 = vsel %vm207_vm0, %v690_v28, 0.0  ;;  %v2631_v30 = vsub.f32 %v2548_v16, %v608_v33 }
 0x23f   : > { %v617_v51 = vmul.f32 %v2614_v42, %v2614_v42  ;;  %v618_v41 = vmul.f32 %v2617_v44, %v2617_v44  ;;  %v619_v58 = vmul.f32 %v2620_v45, %v2620_v45  ;;  %v2639_v55 = vsub.f32 %v467_v43, %v608_v33 }
 0x240   : > { %v699_v50 = vadd.f32 %v698_v21, %v697_v40  ;;  %v693_v13 = vmul.f32 %v2608_v35, %v2608_v35  ;;  %v702_v49 = vsel %vm207_vm0, %v691_v20, 0.0  ;;  %v620_v16 = vmul.f32 %v2623_v47, %v2623_v47 }
 0x241   : > { %v625_v60 = vsel %vm207_vm0, %v617_v51, 0.0  ;;  %v626_v61 = vsel %vm207_vm0, %v618_v41, 0.0  ;;  %v704_v62 = vsel %vm207_vm0, %v692_v5, 0.0  ;;  %v694_v43 = vmul.f32 %v2627_v38, %v2627_v38 }
 0x242   : > { %v701_v48 = vadd.f32 %v700_v39, %v699_v50  ;;  %v627_v0 = vadd.f32 %v626_v61, %v625_v60  ;;  %v2652_v1 = vsub.f32 %v2562_v4, %v608_v33  ;;  %v621_v6 = vmul.f32 %v2631_v30, %v2631_v30 }
 0x243   : > { %v628_v7 = vsel %vm207_vm0, %v619_v58, 0.0  ;;  %v622_v10 = vmul.f32 %v2639_v55, %v2639_v55  ;;  %v706_v11 = vsel %vm207_vm0, %v693_v13, 0.0  ;;  %v2661_v14 = vsub.f32 %v2571_v12, %v608_v33 }
 0x244   : > { %v703_v63 = vadd.f32 %v702_v49, %v701_v48  ;;  %v629_v9 = vadd.f32 %v628_v7, %v627_v0  ;;  %v630_v15 = vsel %vm207_vm0, %v620_v16, 0.0  ;;  %v708_v19 = vsel %vm207_vm0, %v694_v43, 0.0 }
 0x245   : > { %v623_v22 = vmul.f32 %v2652_v1, %v2652_v1  ;;  %v632_v32 = vsel %vm207_vm0, %v621_v6, 0.0  ;;  %v634_v28 = vsel %vm207_vm0, %v622_v10, 0.0  ;;  %v624_v59 = vmul.f32 %v2661_v14, %v2661_v14 }
 0x246   : > { %v705_v8 = vadd.f32 %v704_v62, %v703_v63  ;;  %v631_v4 = vadd.f32 %v630_v15, %v629_v9  ;;  %v2019_v9 = vld [vmem:[%s3464_s3 + $0x70] sm:$0xff] }
 0x247   : > { %v636_v17 = vsel %vm207_vm0, %v623_v22, 0.0  ;;  %v638_v21 = vsel %vm207_vm0, %v624_v59, 0.0 }
 0x248   : > { %v707_v18 = vadd.f32 %v706_v11, %v705_v8  ;;  %v633_v31 = vadd.f32 %v632_v32, %v631_v4 }
 0x24a   : > { %v709_v34 = vadd.f32 %v708_v19, %v707_v18  ;;  %v635_v33 = vadd.f32 %v634_v28, %v633_v31  ;;  %v2015_v18 = vld [vmem:[%s3464_s3 + $0x50] sm:$0xff] }
 0x24c   : > { %v710_v12 = vrot.slane %v709_v34, 4  ;;  %v637_v40 = vadd.f32 %v636_v17, %v635_v33 }
 0x24e   : > { %v711_v20 = vadd.f32 %v710_v12, %v709_v34  ;;  %v639_v50 = vadd.f32 %v638_v21, %v637_v40 }
 0x250   : > { %v712_v5 = vrot.slane %v711_v20, 2  ;;  %v640_v51 = vrot.slane %v639_v50, 4 }
 0x252   : > { %v713_v39 = vadd.f32 %v712_v5, %v711_v20  ;;  %v641_v58 = vadd.f32 %v640_v51, %v639_v50  ;;  %v2758_v5 = vld [vmem:[%s3462_s1 + $0x7] ss:$0 sm:$0xff]  ;;  %v2763_v51 = vld [vmem:[%s3462_s1 + $0x10] ss:$0 sm:$0xff] }
 0x254   : > { %v714_v41 = vrot.slane %v713_v39, 1  ;;  %v642_v48 = vrot.slane %v641_v58, 2 }
 0x256   : > { %v715_v13 = vadd.f32 %v714_v41, %v713_v39  ;;  %v643_v16 = vadd.f32 %v642_v48, %v641_v58 }
 0x258   : > { %v716_v49 = vmul.f32 0.015625, %v715_v13  ;;  %v644_v61 = vrot.slane %v643_v16, 1 }
 0x25a   : > { %v717_v60 = vadd.f32 1e-05, %v716_v49  ;;  %v645_v62 = vadd.f32 %v644_v61, %v643_v16 }
 0x25c   : > { %2269 = vrsqrt.f32 %v717_v60  ;;  %v646_v63 = vmul.f32 0.015625, %v645_v62 }
 0x25e   : > { %v647_v0 = vadd.f32 1e-05, %v646_v63  ;;  %v2769_v63 = vld [vmem:[%s3462_s1 + $0x8] ss:$0 sm:$0xff] }
 0x260   : > { %2271 = vrsqrt.f32 %v647_v0 }
 0x269   : > { %v2270_v43 = vpop.eup %2269 }
 0x26a   : > { %v719_v6 = vmul.f32 %v2270_v43, %v2583_v23  ;;  %v720_v7 = vmul.f32 %v2270_v43, %v2586_v24  ;;  %v721_v8 = vmul.f32 %v2270_v43, %v2589_v25  ;;  %v2018_v23 = vld [vmem:[%s3464_s3 + $0x68] sm:$0xff]  ;;  %v722_v24 = vmul.f32 %v2270_v43, %v2592_v26 }
 0x26b   : > { %v723_v15 = vmul.f32 %v2270_v43, %v2594_v27  ;;  %v724_v26 = vmul.f32 %v2270_v43, %v2602_v53  ;;  %v2014_v27 = vld [vmem:[%s3464_s3 + $0x48] sm:$0xff]  ;;  %v2013_v53 = vld [vmem:[%s3464_s3 + $0x40] sm:$0xff] }
 0x26c   : > { %2168 = vmatprep.mubr.msk.f32.mxu0 %vm207_vm0, %v719_v6 }
 0x26d   : > { %2169 = vmatmul.mubr.msk.f32.vlgmr.msra.gmra.mxu0 %vm207_vm0, %v720_v7  ;;  %v2272_v10 = vpop.eup %2271 }
 0x26e   : > { %2201 = vmatpush3.msra.mxu0 %v2456_v2  ;;  %2171 = vmatprep.mubr.msk.f32.mxu0 %vm207_vm0, %v721_v8  ;;  %v649_v25 = vmul.f32 %v2272_v10, %v2614_v42  ;;  %v650_v11 = vmul.f32 %v2272_v10, %v2617_v44  ;;  %v651_v2 = vmul.f32 %v2272_v10, %v2620_v45 }
 0x26f   : > { %2202 = vmatprep.subr.mxu0 %v2019_v9  ;;  %v725_v42 = vmul.f32 %v2270_v43, %v2608_v35  ;;  %v652_v44 = vmul.f32 %v2272_v10, %v2623_v47  ;;  %v653_v45 = vmul.f32 %v2272_v10, %v2631_v30  ;;  %v726_v35 = vmul.f32 %v2270_v43, %v2627_v38 }
 0x270   : > { %2203 = vmatpush3.msra.mxu0 %v2019_v9  ;;  %2188 = vmatprep.mubr.msk.f32.mxu1 %vm207_vm0, %v649_v25  ;;  %v654_v47 = vmul.f32 %v2272_v10, %v2639_v55  ;;  %v655_v30 = vmul.f32 %v2272_v10, %v2652_v1  ;;  %v656_v4 = vmul.f32 %v2272_v10, %v2661_v14  ;;  %v2281_v38 = vmov 0.0  }
 0x271   : > { %2172 = vmatmul.mubr.msk.f32.gmra.mxu0 %vm207_vm0, %v722_v24  ;;  %2204 = vmatprep.subr.mxu0 %v2018_v23  ;;  %1214 = vst.msk [vmem:[#allocation2] sm:$0xff] %vm207_vm0, %v2281_v38  ;;  %1219 = vst.msk [vmem:[#allocation3] sm:$0xff] %vm207_vm0, %v2281_v38  ;;  %v1239_v14 = vlaneseq }
 0x272   : > { %2174 = vmatprep.mubr.msk.f32.mxu0 %vm207_vm0, %v723_v15  ;;  %2189 = vmatmul.mubr.msk.f32.vlgmr.msra.gmra.mxu1 %vm207_vm0, %v650_v11  ;;  %1216 = vst.msk [vmem:[#allocation2 + $0x8] sm:$0x1] %vm1215_vm1, %v2281_v38  ;;  %1218 = vst.msk [vmem:[#allocation2 + $0x51] sm:$0x1] %vm1215_vm1, %v2281_v38 }
 0x273   : > { %2205 = vmatpush3.msra.mxu0 %v2018_v23  ;;  %2221 = vmatpush3.msra.mxu1 %v2461_v3  ;;  %v2017_v3 = vld [vmem:[%s3464_s3 + $0x60] sm:$0xff]  ;;  %1220 = vst.msk [vmem:[#allocation3 + $0x8] sm:$0x1] %vm1215_vm1, %v2281_v38  ;;  %1222 = vst.msk [vmem:[#allocation3 + $0x51] sm:$0x1] %vm1215_vm1, %v2281_v38  ;;  %v1240_v31 = vshrl.u32 %v1239_v14, 7 }
 0x274   : > { %2191 = vmatprep.mubr.msk.f32.mxu1 %vm207_vm0, %v651_v2  ;;  %2222 = vmatprep.subr.mxu1 %v2015_v18  ;;  %1217 = vst.msk [vmem:[#allocation2 + $0x49] sm:$0xff] %vm207_vm0, %v2281_v38  ;;  %1221 = vst.msk [vmem:[#allocation3 + $0x49] sm:$0xff] %vm207_vm0, %v2281_v38  ;;  %v2776_v23 = vld [vmem:[%s3462_s1 + $0x11] ss:$0 sm:$0xff] }
 0x275   : > { %2175 = vmatmul.mubr.msk.f32.gmra.mxu0 %vm207_vm0, %v724_v26  ;;  %2223 = vmatpush3.msra.mxu1 %v2015_v18  ;;  %v1241_v33 = vadd.s32 8, %v1240_v31  ;;  %v1242_v17 = vadd.s32 16, %v1240_v31  ;;  %v1252_v58 = vand.u32 7, %v1240_v31  ;;  %v1243_v13 = vadd.s32 24, %v1240_v31 }
 0x276   : > { %2177 = vmatprep.mubr.msk.f32.mxu0 %vm207_vm0, %v725_v42  ;;  %2192 = vmatmul.mubr.msk.f32.gmra.mxu1 %vm207_vm0, %v652_v44  ;;  %v1244_v48 = vadd.s32 32, %v1240_v31  ;;  %v1245_v62 = vadd.s32 40, %v1240_v31  ;;  %v1246_v43 = vadd.s32 48, %v1240_v31 }
 0x277   : > { %2224 = vmatprep.subr.mxu1 %v2014_v27  ;;  %2194 = vmatprep.mubr.msk.f32.mxu1 %vm207_vm0, %v653_v45  ;;  %v1259_v60 = vand.u32 7, %v1241_v33  ;;  %v1266_v61 = vand.u32 7, %v1242_v17  ;;  %vm2781_vm2 = vcmp.ge.s32.totalorder %v1252_v58, 1  ;;  %vm2785_vm3 = vcmp.le.s32.totalorder %v1252_v58, 6  ;;  %v2845_v17 = vld [vmem:[%s3462_s1 + $0xa] ss:$0 sm:$0xff] }
 0x278   : > { %2225 = vmatpush3.msra.mxu1 %v2014_v27  ;;  %2206 = vmatprep.subr.mxu0 %v2017_v3  ;;  %v1392_v21 = vld [vmem:[#allocation2] sm:$0xff]  ;;  %v1421_v39 = vld [vmem:[#allocation3] sm:$0xff]  ;;  %v1273_v18 = vand.u32 7, %v1243_v13  ;;  %v2869_v58 = vld [vmem:[%s3462_s1 + $0xe] ss:$0 sm:$0xff] }
 0x279   : > { %2226 = vmatprep.subr.mxu1 %v2013_v53  ;;  %2178 = vmatmul.mubr.msk.f32.gmra.mxu0 %vm207_vm0, %v726_v35  ;;  %vm1345_vm4 = vcmp.ge.s32.totalorder %v1259_v60, 1  ;;  %vm1346_vm5 = vcmp.ge.s32.totalorder %v1266_v61, 1  ;;  %vm1369_vm6 = vcmp.le.s32.totalorder %v1259_v60, 6  ;;  %vm2830_vm9 = vcmp.le.s32.totalorder %v1266_v61, 6 }
 0x27a   : > { %2227 = vmatpush3.msra.mxu1 %v2013_v53  ;;  %2207 = vmatpush3.msra.mxu0 %v2017_v3  ;;  %v1583_v9 = vld [vmem:[#allocation3 + $0x1] sm:$0xff]  ;;  %vm2817_vm7 = vcmp.ge.s32.totalorder %v1273_v18, 1  ;;  %vm2834_vm10 = vcmp.le.s32.totalorder %v1273_v18, 6 }
 0x27b   : > { %2195 = vmatmul.mubr.msk.f32.gmra.mxu1 %vm207_vm0, %v654_v47  ;;  %2208 = vmatprep.mubr.msk.f32.mxu0 %vm207_vm0, %v719_v6  ;;  %v1405_v6 = vmul.f32 %v2758_v5, %v1392_v21  ;;  %v1596_v3 = vmul.f32 %v2776_v23, %v1583_v9  ;;  %v2910_v9 = vsel %vm2830_vm9, 1.0, %v2281_v38 }
 0x27c   : > { %2197 = vmatprep.mubr.msk.f32.mxu1 %vm207_vm0, %v655_v30  ;;  %3509 = vst [vmem:[#allocation15_spill] sm:$0xff] %v2910_v9 }
 0x27d   : > { %2209 = vmatmul.mubr.msk.f32.vlgmr.msra.gmra.mxu0 %vm207_vm0, %v720_v7  ;;  %v1434_v7 = vmul.f32 %v2763_v51, %v1421_v39 }
 0x27e   : > { %2211 = vmatprep.mubr.msk.f32.mxu0 %vm207_vm0, %v721_v8  ;;  %v1554_v8 = vld [vmem:[#allocation2 + $0x1] sm:$0xff] }
 0x27f   : > { %2198 = vmatmul.mubr.msk.f32.gmra.mxu1 %vm207_vm0, %v656_v4 }
 0x280   : > { %2228 = vmatprep.mubr.msk.f32.mxu1 %vm207_vm0, %v649_v25  ;;  %v1247_v25 = vadd.s32 56, %v1240_v31 }
 0x281   : > { %2212 = vmatmul.mubr.msk.f32.gmra.mxu0 %vm207_vm0, %v722_v24 }
 0x282   : > { %2214 = vmatprep.mubr.msk.f32.mxu0 %vm207_vm0, %v723_v15  ;;  %v1810_v15 = vld [vmem:[#allocation2 + $0x4a] sm:$0xff] }
 0x283   : > { %2229 = vmatmul.mubr.msk.f32.vlgmr.msra.gmra.mxu1 %vm207_vm0, %v650_v11 }
 0x284   : > { %2231 = vmatprep.mubr.msk.f32.mxu1 %vm207_vm0, %v651_v2  ;;  %v1832_v2 = vld [vmem:[#allocation3 + $0x4a] sm:$0xff] }
 0x285   : > { %2215 = vmatmul.mubr.msk.f32.gmra.mxu0 %vm207_vm0, %v724_v26  ;;  %v1280_v26 = vand.u32 7, %v1244_v48 }
 0x286   : > { %2217 = vmatprep.mubr.msk.f32.mxu0 %vm207_vm0, %v725_v42 }
 0x287   : > { %2232 = vmatmul.mubr.msk.f32.gmra.mxu1 %vm207_vm0, %v652_v44  ;;  %v1287_v44 = vand.u32 7, %v1245_v62  ;;  %vm2821_vm8 = vcmp.ge.s32.totalorder %v1280_v26, 1  ;;  %vm2853_vm13 = vcmp.le.s32.totalorder %v1280_v26, 6  ;;  %v1656_v62 = vld [vmem:[#allocation2 + $0x49] sm:$0xff] }
 0x288   : > { %2234 = vmatprep.mubr.msk.f32.mxu1 %vm207_vm0, %v653_v45  ;;  %v1567_v45 = vmul.f32 %v2769_v63, %v1554_v8  ;;  %v2958_v33 = vmul.f32 %v2869_v58, %v1656_v62 }
 0x289   : > { %2218 = vmatmul.mubr.msk.f32.gmra.mxu0 %vm207_vm0, %v726_v35  ;;  %v1294_v35 = vand.u32 7, %v1246_v43  ;;  %vm2838_vm11 = vcmp.ge.s32.totalorder %v1287_v44, 1  ;;  %vm2857_vm14 = vcmp.le.s32.totalorder %v1287_v44, 6 }
 0x28a   : > { %v1604_v43 = vadd.f32 %v1596_v3, %v1567_v45  ;;  %v2924_v44 = vsel %vm2838_vm11, 1.0, %v2281_v38  ;;  %v2934_v3 = vsel %vm2853_vm13, 1.0, %v2281_v38  ;;  %3519 = vst [vmem:[#allocation23_spill] sm:$0xff] %v2958_v33 }
 0x28b   : > { %2235 = vmatmul.mubr.msk.f32.gmra.mxu1 %vm207_vm0, %v654_v47  ;;  %v2794_v47 = vadd.f32 %v1434_v7, %v1405_v6  ;;  %vm2849_vm12 = vcmp.ge.s32.totalorder %v1294_v35, 1  ;;  %vm2887_vm1 = vcmp.le.s32.totalorder %v1294_v35, 6  ;;  %v2899_v6 = vld [vmem:[%s3462_s1 + $0xf] ss:$0 sm:$0xff]  ;;  %v2905_v7 = vld [vmem:[%s3462_s1 + $0x17] ss:$0 sm:$0xff] }
 0x28c   : > { %2237 = vmatprep.mubr.msk.f32.mxu1 %vm207_vm0, %v655_v30  ;;  %3513 = vst [vmem:[#allocation17_spill] sm:$0xff] %v2924_v44  ;;  %v2929_v45 = vsel %vm2849_vm12, 1.0, %v2281_v38  ;;  %3515 = vst [vmem:[#allocation19_spill] sm:$0xff] %v2934_v3  ;;  %v2974_v57 = vmul.f32 %v2899_v6, %v1810_v15 }
 0x28d   : > { %3514 = vst [vmem:[#allocation18_spill] sm:$0xff] %v2929_v45 }
 0x28e   : > { %3522 = vst [vmem:[#allocation26_spill] sm:$0xff] %v2974_v57 }
 0x28f   : > { %2238 = vmatmul.mubr.msk.f32.gmra.mxu1 %vm207_vm0, %v656_v4  ;;  %v2802_v4 = vsel %vm2781_vm2, 1.0, %v2281_v38 }
 0x32d   : > { %v2170_v55 = vpop.f32.mrf.mxu0 }
 0x32f   : > { %v826_v1 = vpop.f32.mrf.mxu0 }
 0x331   : > { %v2173_v19 = vpop.f32.mrf.mxu0 }
 0x332   : > { %v2190_v22 = vpop.f32.mrf.mxu1 }
 0x333   : > { %v836_v32 = vpop.f32.mrf.mxu0  ;;  %v961_v34 = vadd.f32 %v2190_v22, %v2170_v55  ;;  %v2807_v55 = vsel %vm2785_vm3, 1.0, %v2281_v38  ;;  %v2815_v22 = vsel %vm1346_vm5, 1.0, %v2281_v38 }
 0x334   : > { %v955_v28 = vpop.f32.mrf.mxu1 }
 0x335   : > { %v2176_v59 = vpop.f32.mrf.mxu0  ;;  %1224 = vst.msk [vmem:[#allocation2 + $0x11] sm:$0xff] %vm207_vm0, %v961_v34  ;;  %v956_v12 = vadd.f32 %v955_v28, %v826_v1  ;;  %v1301_v1 = vand.u32 7, %v1247_v25  ;;  %v2828_v28 = vsel %vm1369_vm6, 1.0, %v2281_v38  ;;  %v2945_v34 = vld [vmem:[%s3462_s1 + $0x18] ss:$0 sm:$0xff] }
 0x336   : > { %v2193_v20 = vpop.f32.mrf.mxu1  ;;  %3490 = vst [vmem:[#allocation12_spill] sm:$0xff] %v2828_v28  ;;  %v2977_v62 = vmul.f32 %v2945_v34, %v1832_v2  ;;  %v2992_v25 = vld [vmem:[%s3462_s1 + $0xc] ss:$0 sm:$0xff] }
 0x337   : > { %v846_v40 = vpop.f32.mrf.mxu0  ;;  %1223 = vst.msk [vmem:[#allocation2 + $0x9] sm:$0xff] %vm207_vm0, %v956_v12  ;;  %v971_v50 = vadd.f32 %v2193_v20, %v2173_v19  ;;  %v2812_v19 = vsel %vm1345_vm4, 1.0, %v2281_v38  ;;  %vm2883_vm15 = vcmp.ge.s32.totalorder %v1301_v1, 1  ;;  %vm2917_vm2 = vcmp.le.s32.totalorder %v1301_v1, 6 }
 0x338   : > { %v965_v41 = vpop.f32.mrf.mxu1  ;;  %v2955_v12 = vsel %vm2887_vm1, 1.0, %v2281_v38  ;;  %v2968_v60 = vsel %vm2917_vm2, 1.0, %v2281_v38  ;;  %3523 = vst [vmem:[#allocation27_spill] sm:$0xff] %v2977_v62 }
 0x339   : > { %1226 = vst.msk [vmem:[#allocation2 + $0x21] sm:$0xff] %vm207_vm0, %v971_v50  ;;  %v966_v49 = vadd.f32 %v965_v41, %v836_v32  ;;  %v2179_v16 = vpop.f32.mrf.mxu0  ;;  %v2864_v41 = vld [vmem:[%s3462_s1 + $0xb] ss:$0 sm:$0xff]  ;;  %3518 = vst [vmem:[#allocation22_spill] sm:$0xff] %v2955_v12  ;;  %v2963_v50 = vld [vmem:[%s3462_s1 + $0x9] ss:$0 sm:$0xff] }
 0x33a   : > { %3520 = vst [vmem:[#allocation24_spill] sm:$0xff] %v2968_v60 }
 0x33b   : > { %v2196_v0 = vpop.f32.mrf.mxu1  ;;  %1225 = vst.msk [vmem:[#allocation2 + $0x19] sm:$0xff] %vm207_vm0, %v966_v49  ;;  %v2779_v24 = vpop.f32.mrf.mxu0  ;;  %v2876_v49 = vsel %vm2817_vm7, 1.0, %v2281_v38 }
 0x33c   : > { %v981_v10 = vadd.f32 %v2196_v0, %v2176_v59  ;;  %3503 = vst [vmem:[#allocation13_spill] sm:$0xff] %v2876_v49  ;;  %v2894_v0 = vld [vmem:[%s3462_s1 + $0xd] ss:$0 sm:$0xff]  ;;  %v1556_v18 = vld [vmem:[#allocation2 + $0x11] sm:$0xff]  ;;  %v2950_v59 = vsel %vm2883_vm15, 1.0, %v2281_v38 }
 0x33d   : > { %v975_v11 = vpop.f32.mrf.mxu1  ;;  %v2790_v42 = vpop.f32.mrf.mxu0  ;;  %3517 = vst [vmem:[#allocation21_spill] sm:$0xff] %v2950_v59  ;;  %v2980_v56 = vmul.f32 %v2769_v63, %v1556_v18  ;;  %v2983_v54 = vmul.f32 %v2864_v41, %v1556_v18  ;;  %v2986_v52 = vmul.f32 %v2869_v58, %v1556_v18 }
 0x33e   : > { %1228 = vst.msk [vmem:[#allocation2 + $0x31] sm:$0xff] %vm207_vm0, %v981_v10  ;;  %v976_v27 = vadd.f32 %v975_v11, %v846_v40  ;;  %v1393_v13 = vld [vmem:[#allocation2 + $0x8] sm:$0xff]  ;;  %v2915_v10 = vsel %vm2834_vm10, 1.0, %v2281_v38  ;;  %v1394_v35 = vld [vmem:[#allocation2 + $0x10] sm:$0xff] }
 0x33f   : > { %v2199_v53 = vpop.f32.mrf.mxu1  ;;  %v2797_v30 = vpop.f32.mrf.mxu0  ;;  %3510 = vst [vmem:[#allocation16_spill] sm:$0xff] %v2915_v10  ;;  %v1678_v11 = vld [vmem:[#allocation3 + $0x49] sm:$0xff]  ;;  %v1555_v26 = vld [vmem:[#allocation2 + $0x9] sm:$0xff]  ;;  %v1456_v1 = vmul.f32 %v2845_v17, %v1393_v13  ;;  %v2995_v15 = vmul.f32 %v2758_v5, %v1393_v13  ;;  %v2998_v2 = vmul.f32 %v2758_v5, %v1394_v35  ;;  %v3001_v60 = vmul.f32 %v2845_v17, %v1394_v35 }
 0x340   : > { %1227 = vst.msk [vmem:[#allocation2 + $0x29] sm:$0xff] %vm207_vm0, %v976_v27  ;;  %v991_v20 = vadd.f32 %v2199_v53, %v2179_v16  ;;  %v2881_v16 = vsel %vm2821_vm8, 1.0, %v2281_v38  ;;  %v2939_v53 = vsel %vm2857_vm14, 1.0, %v2281_v38  ;;  %v1709_v21 = vld [vmem:[#allocation2 + $0xa] sm:$0xff]  ;;  %v2971_v61 = vmul.f32 %v2905_v7, %v1678_v11  ;;  %v1558_v12 = vld [vmem:[#allocation2 + $0x21] sm:$0xff] }
 0x341   : > { %v2809_v14 = vpop.f32.mrf.mxu1  ;;  %v2825_v31 = vpop.f32.mrf.mxu0  ;;  %3504 = vst [vmem:[#allocation14_spill] sm:$0xff] %v2881_v16  ;;  %3516 = vst [vmem:[#allocation20_spill] sm:$0xff] %v2939_v53  ;;  %v1618_v38 = vmul.f32 %v2864_v41, %v1555_v26  ;;  %v3004_v18 = vmul.f32 %v2894_v0, %v1394_v35  ;;  %v3007_v53 = vadd.f32 %v1456_v1, %v2794_v47 }
 0x342   : > { %1230 = vst.msk [vmem:[#allocation2 + $0x41] sm:$0xff] %vm207_vm0, %v991_v20  ;;  %v1708_v20 = vld [vmem:[#allocation2 + $0x2] sm:$0xff]  ;;  %3521 = vst [vmem:[#allocation25_spill] sm:$0xff] %v2971_v61  ;;  %v3010_v62 = vmul.f32 %v2769_v63, %v1555_v26  ;;  %v3016_v13 = vmul.f32 %v2963_v50, %v1709_v21  ;;  %v1395_v57 = vld [vmem:[#allocation2 + $0x18] sm:$0xff]  ;;  %v3019_v45 = vmul.f32 %v2992_v25, %v1709_v21 }
 0x343   : > { %v2847_v40 = vpop.f32.mrf.mxu1  ;;  %v2871_v48 = vpop.f32.mrf.mxu0  ;;  %v3013_v3 = vmul.f32 %v2963_v50, %v1708_v20  ;;  %v1396_v35 = vld [vmem:[#allocation2 + $0x20] sm:$0xff]  ;;  %v986_v47 = vadd.f32 %v2809_v14, %v2779_v24  ;;  %v3026_v20 = vadd.f32 %v1618_v38, %v1604_v43  ;;  %v3029_v33 = vmul.f32 %v2769_v63, %v1558_v12  ;;  %v1710_v14 = vld [vmem:[#allocation2 + $0x12] sm:$0xff] }
 0x344   : > { %v1181_v26 = vadd.f32 %v2847_v40, %v2790_v42  ;;  %v3032_v44 = vmul.f32 %v2864_v41, %v1558_v12  ;;  %v3035_v21 = vmul.f32 %v2869_v58, %v1558_v12  ;;  %v1557_v46 = vld [vmem:[#allocation2 + $0x19] sm:$0xff]  ;;  %v3038_v24 = vmul.f32 %v2758_v5, %v1395_v57 }
 0x345   : > { %v1175_v8 = vpop.f32.mrf.mxu1  ;;  %v2216_v27 = vpop.f32.mrf.mxu0  ;;  %v1711_v42 = vld [vmem:[#allocation2 + $0x1a] sm:$0xff]  ;;  %1229 = vst.msk [vmem:[#allocation2 + $0x39] sm:$0xff] %vm207_vm0, %v986_v47  ;;  %v3049_v12 = vmul.f32 %v2845_v17, %v1395_v57  ;;  %v3052_v38 = vmul.f32 %v2845_v17, %v1396_v35 }
 0x346   : > { %v1176_v1 = vadd.f32 %v1175_v8, %v2797_v30  ;;  %3524 = vst [vmem:[#allocation28_spill] sm:$0xff] %v3032_v44  ;;  %1232 = vst.msk [vmem:[#allocation3 + $0x11] sm:$0xff] %vm207_vm0, %v1181_v26  ;;  %v3046_v8 = vmul.f32 %v2758_v5, %v1396_v35  ;;  %v3055_v26 = vmul.f32 %v2894_v0, %v1395_v57 }
 0x347   : > { %v2233_v32 = vpop.f32.mrf.mxu1  ;;  %v1090_v39 = vpop.f32.mrf.mxu0  ;;  %v3070_v57 = vmul.f32 %v2869_v58, %v1557_v46  ;;  %v1712_v37 = vld [vmem:[#allocation2 + $0x22] sm:$0xff]  ;;  %v1713_v36 = vld [vmem:[#allocation2 + $0x2a] sm:$0xff] }
 0x348   : > { %1231 = vst.msk [vmem:[#allocation3 + $0x9] sm:$0xff] %vm207_vm0, %v1176_v1  ;;  %v1191_v30 = vadd.f32 %v2233_v32, %v2825_v31  ;;  %v3058_v31 = vmul.f32 %v2894_v0, %v1396_v35  ;;  %v1398_v35 = vld [vmem:[#allocation2 + $0x30] sm:$0xff] }
 0x349   : > { %v1185_v11 = vpop.f32.mrf.mxu1  ;;  %v2219_v59 = vpop.f32.mrf.mxu0 }
 0x34a   : > { %v1186_v40 = vadd.f32 %v1185_v11, %v2871_v48  ;;  %v3061_v48 = vmul.f32 %v2769_v63, %v1557_v46  ;;  %1234 = vst.msk [vmem:[#allocation3 + $0x21] sm:$0xff] %vm207_vm0, %v1191_v30  ;;  %v1397_v11 = vld [vmem:[#allocation2 + $0x28] sm:$0xff]  ;;  %v3080_v30 = vmul.f32 %v2992_v25, %v1710_v14 }
 0x34b   : > { %v2236_v61 = vpop.f32.mrf.mxu1  ;;  %v1100_v9 = vpop.f32.mrf.mxu0 }
 0x34c   : > { %v1201_v43 = vadd.f32 %v2236_v61, %v2216_v27  ;;  %v1560_v27 = vld [vmem:[#allocation2 + $0x31] sm:$0xff]  ;;  %1233 = vst.msk [vmem:[#allocation3 + $0x19] sm:$0xff] %vm207_vm0, %v1186_v40  ;;  %v3076_v61 = vmul.f32 %v2963_v50, %v1711_v42  ;;  %v1559_v40 = vld [vmem:[#allocation2 + $0x29] sm:$0xff] }
 0x34d   : > { %v1195_v29 = vpop.f32.mrf.mxu1  ;;  %v3093_v16 = vmul.f32 %v2769_v63, %v1560_v27  ;;  %v3099_v49 = vmul.f32 %v2869_v58, %v1560_v27  ;;  %v3127_v28 = vmul.f32 %v2869_v58, %v1559_v40 }
 0x34e   : > { %v1196_v10 = vadd.f32 %v1195_v29, %v1090_v39  ;;  %1236 = vst.msk [vmem:[#allocation3 + $0x31] sm:$0xff] %vm207_vm0, %v1201_v43  ;;  %v3067_v29 = vmul.f32 %v2864_v41, %v1557_v46  ;;  %v3073_v39 = vmul.f32 %v2963_v50, %v1710_v14  ;;  %3525 = vst [vmem:[#allocation29_spill] sm:$0xff] %v3076_v61 }
 0x34f   : > { %v2239_v47 = vpop.f32.mrf.mxu1  ;;  %v3086_v46 = vmul.f32 %v2899_v6, %v1710_v14  ;;  %3526 = vst [vmem:[#allocation30_spill] sm:$0xff] %v3093_v16  ;;  %3528 = vst [vmem:[#allocation32_spill] sm:$0xff] %v3099_v49  ;;  %v3102_v14 = vmul.f32 %v2758_v5, %v1397_v11  ;;  %v3118_v49 = vmul.f32 %v2894_v0, %v1398_v35  ;;  %v1612_v16 = vld [vmem:[#allocation2 + $0x41] sm:$0xff] }
 0x350   : > { %v1211_v32 = vadd.f32 %v2239_v47, %v2219_v59  ;;  %1235 = vst.msk [vmem:[#allocation3 + $0x29] sm:$0xff] %vm207_vm0, %v1196_v10  ;;  %v3083_v59 = vmul.f32 %v2992_v25, %v1711_v42  ;;  %v3090_v47 = vmul.f32 %v2899_v6, %v1711_v42  ;;  %v3096_v10 = vmul.f32 %v2864_v41, %v1560_v27 }
 0x351   : > { %v1205_v1 = vpop.f32.mrf.mxu1  ;;  %3529 = vst [vmem:[#allocation33_spill] sm:$0xff] %v3102_v14  ;;  %v3111_v42 = vmul.f32 %v2845_v17, %v1398_v35  ;;  %v3115_v27 = vmul.f32 %v2894_v0, %v1397_v11  ;;  %3533 = vst [vmem:[#allocation37_spill] sm:$0xff] %v3118_v49  ;;  %v1766_v14 = vld [vmem:[#allocation2 + $0x42] sm:$0xff] }
 0x352   : > { %1238 = vst.msk [vmem:[#allocation3 + $0x41] sm:$0xff] %vm207_vm0, %v1211_v32  ;;  %v1206_v43 = vadd.f32 %v1205_v1, %v1100_v9  ;;  %3527 = vst [vmem:[#allocation31_spill] sm:$0xff] %v3096_v10  ;;  %v3105_v32 = vmul.f32 %v2758_v5, %v1398_v35  ;;  %v3108_v9 = vmul.f32 %v2845_v17, %v1397_v11  ;;  %v1494_v1 = vld [vmem:[#allocation2 + $0x48] sm:$0xff]  ;;  %v1450_v49 = vld [vmem:[#allocation2 + $0x40] sm:$0xff] }
 0x353   : > { %3531 = vst [vmem:[#allocation35_spill] sm:$0xff] %v3111_v42  ;;  %3532 = vst [vmem:[#allocation36_spill] sm:$0xff] %v3115_v27  ;;  %v3121_v10 = vmul.f32 %v2769_v63, %v1559_v40  ;;  %v3130_v42 = vmul.f32 %v2963_v50, %v1712_v37  ;;  %v3133_v11 = vmul.f32 %v2963_v50, %v1713_v36  ;;  %v1422_v27 = vld [vmem:[#allocation3 + $0x8] sm:$0xff] }
 0x354   : > { %3530 = vst [vmem:[#allocation34_spill] sm:$0xff] %v3105_v32  ;;  %1237 = vst.msk [vmem:[#allocation3 + $0x39] sm:$0xff] %vm207_vm0, %v1206_v43  ;;  %v3124_v32 = vmul.f32 %v2864_v41, %v1559_v40  ;;  %v3136_v35 = vmul.f32 %v2992_v25, %v1712_v37  ;;  %v1399_v43 = vld [vmem:[#allocation2 + $0x38] sm:$0xff]  ;;  %v3145_v40 = vmul.f32 %v2899_v6, %v1713_v36 }
 0x355   : > { %3534 = vst [vmem:[#allocation38_spill] sm:$0xff] %v3121_v10  ;;  %3536 = vst [vmem:[#allocation40_spill] sm:$0xff] %v3127_v28  ;;  %v3139_v10 = vmul.f32 %v2992_v25, %v1713_v36  ;;  %v3148_v28 = vmul.f32 %v2894_v0, %v1494_v1  ;;  %v3165_v36 = vmul.f32 %v2899_v6, %v1766_v14  ;;  %v1423_v1 = vld [vmem:[#allocation3 + $0x10] sm:$0xff] }
 0x356   : > { %3535 = vst [vmem:[#allocation39_spill] sm:$0xff] %v3124_v32  ;;  %3537 = vst [vmem:[#allocation41_spill] sm:$0xff] %v3130_v42  ;;  %v3142_v32 = vmul.f32 %v2899_v6, %v1712_v37  ;;  %v1561_v42 = vld [vmem:[#allocation2 + $0x39] sm:$0xff]  ;;  %v3162_v37 = vmul.f32 %v2992_v25, %v1766_v14  ;;  %v3174_v61 = vmul.f32 %v2845_v17, %v1450_v49  ;;  %v3182_v14 = vld [vmem:[%s3462_s1 + $0x12] ss:$0 sm:$0xff] }
 0x357   : > { %3538 = vst [vmem:[#allocation42_spill] sm:$0xff] %v3133_v11  ;;  %3539 = vst [vmem:[#allocation43_spill] sm:$0xff] %v3136_v35  ;;  %v3153_v11 = vld [vmem:[%s3462_s1 + $0x13] ss:$0 sm:$0xff]  ;;  %v3156_v35 = vmul.f32 %v2864_v41, %v1612_v16 }
 0x358   : > { %3540 = vst [vmem:[#allocation44_spill] sm:$0xff] %v3139_v10  ;;  %3541 = vst [vmem:[#allocation45_spill] sm:$0xff] %v3142_v32  ;;  %v3159_v10 = vmul.f32 %v2869_v58, %v1612_v16  ;;  %v3171_v32 = vmul.f32 %v2845_v17, %v1399_v43  ;;  %v3177_v16 = vmul.f32 %v2894_v0, %v1399_v43 }
 0x359   : > { %3542 = vst [vmem:[#allocation46_spill] sm:$0xff] %v3145_v40  ;;  %3543 = vst [vmem:[#allocation47_spill] sm:$0xff] %v3148_v28  ;;  %v1584_v28 = vld [vmem:[#allocation3 + $0x9] sm:$0xff]  ;;  %v3168_v40 = vmul.f32 %v2758_v5, %v1399_v43  ;;  %v3188_v5 = vmul.f32 %v2769_v63, %v1561_v42  ;;  %v1435_v17 = vmul.f32 %v2763_v51, %v1422_v27 }
 0x35a   : > { %3544 = vst [vmem:[#allocation48_spill] sm:$0xff] %v3156_v35  ;;  %3545 = vst [vmem:[#allocation49_spill] sm:$0xff] %v3159_v10  ;;  %v1714_v10 = vld [vmem:[#allocation2 + $0x32] sm:$0xff]  ;;  %v1585_v35 = vld [vmem:[#allocation3 + $0x11] sm:$0xff]  ;;  %v1436_v63 = vmul.f32 %v2763_v51, %v1423_v1 }
 0x35b   : > { %3546 = vst [vmem:[#allocation50_spill] sm:$0xff] %v3162_v37  ;;  %3547 = vst [vmem:[#allocation51_spill] sm:$0xff] %v3165_v36  ;;  %v3185_v36 = vmul.f32 %v2894_v0, %v1450_v49  ;;  %v1715_v37 = vld [vmem:[#allocation2 + $0x3a] sm:$0xff]  ;;  %v3201_v49 = vld [vmem:[%s3462_s1 + $0x14] ss:$0 sm:$0xff]  ;;  %v1597_v0 = vmul.f32 %v2776_v23, %v1584_v28  ;;  %v3218_v44 = vmul.f32 %v2992_v25, %v1714_v10 }
 0x35c   : > { %3548 = vst [vmem:[#allocation52_spill] sm:$0xff] %v3168_v40  ;;  %3549 = vst [vmem:[#allocation53_spill] sm:$0xff] %v3171_v32  ;;  %v1737_v43 = vld [vmem:[#allocation3 + $0x2] sm:$0xff]  ;;  %v3196_v40 = vmul.f32 %v2869_v58, %v1561_v42  ;;  %v1738_v58 = vld [vmem:[#allocation3 + $0xa] sm:$0xff] }
 0x35d   : > { %3550 = vst [vmem:[#allocation54_spill] sm:$0xff] %v3174_v61  ;;  %3551 = vst [vmem:[#allocation55_spill] sm:$0xff] %v3177_v16  ;;  %v1478_v61 = vmul.f32 %v3153_v11, %v1422_v27  ;;  %v3193_v16 = vmul.f32 %v2864_v41, %v1561_v42  ;;  %v1443_v27 = vadd.f32 %v1435_v17, %v2995_v15 }
 0x35e   : > { %3552 = vst [vmem:[#allocation56_spill] sm:$0xff] %v3185_v36  ;;  %3553 = vst [vmem:[#allocation57_spill] sm:$0xff] %v3188_v5  ;;  %v3206_v36 = vmul.f32 %v2963_v50, %v1714_v10  ;;  %v3212_v42 = vmul.f32 %v2963_v50, %v1715_v37  ;;  %v1605_v5 = vadd.f32 %v1597_v0, %v3010_v62  ;;  %v3232_v62 = vld [vmem:[%s3462_s1 + $0x16] ss:$0 sm:$0xff] }
 0x35f   : > { %3554 = vst [vmem:[#allocation58_spill] sm:$0xff] %v3193_v16  ;;  %3555 = vst [vmem:[#allocation59_spill] sm:$0xff] %v3196_v40  ;;  %v1486_v41 = vadd.f32 %v1478_v61, %v3007_v53  ;;  %v1640_v16 = vmul.f32 %v3201_v49, %v1584_v28  ;;  %v1598_v40 = vmul.f32 %v2776_v23, %v1585_v35 }
 0x360   : > { %3556 = vst [vmem:[#allocation60_spill] sm:$0xff] %v3206_v36  ;;  %v1750_v32 = vmul.f32 %v3182_v14, %v1737_v43  ;;  %v3221_v36 = vmul.f32 %v2992_v25, %v1715_v37  ;;  %v1465_v53 = vadd.f32 %v3001_v60, %v1443_v27  ;;  %v1479_v28 = vmul.f32 %v3153_v11, %v1423_v1  ;;  %v1587_v25 = vld [vmem:[#allocation3 + $0x21] sm:$0xff]  ;;  %v1424_v43 = vld [vmem:[#allocation3 + $0x18] sm:$0xff] }
 0x361   : > { %v3226_v15 = vmul.f32 %v2899_v6, %v1714_v10  ;;  %v1444_v50 = vadd.f32 %v1436_v63, %v2998_v2  ;;  %v1751_v61 = vmul.f32 %v3182_v14, %v1738_v58  ;;  %v3237_v60 = vmul.f32 %v2899_v6, %v1715_v37  ;;  %v3244_v2 = vld [vmem:[%s3462_s1 + $0x15] ss:$0 sm:$0xff] }
 0x362   : > { %v1758_v17 = vadd.f32 %v1750_v32, %v3013_v3  ;;  %v1487_v0 = vadd.f32 %v1479_v28, %v1465_v53  ;;  %v1508_v10 = vadd.f32 %v3004_v18, %v1486_v41  ;;  %v1648_v27 = vadd.f32 %v1640_v16, %v3026_v20  ;;  %v1425_v53 = vld [vmem:[#allocation3 + $0x20] sm:$0xff] }
 0x363   : > { %3557 = vst [vmem:[#allocation61_spill] sm:$0xff] %v3226_v15  ;;  %3558 = vst [vmem:[#allocation62_spill] sm:$0xff] %v3237_v60  ;;  %v1606_v63 = vadd.f32 %v1598_v40, %v2980_v56  ;;  %v1641_v15 = vmul.f32 %v3201_v49, %v1585_v35  ;;  %v1684_v3 = vmul.f32 %v2905_v7, %v1585_v35  ;;  %v1586_v35 = vld [vmem:[#allocation3 + $0x19] sm:$0xff] }
 0x364   : > { %v1627_v32 = vadd.f32 %v2983_v54, %v1605_v5  ;;  %v1522_v6 = vmul.f32 %v3232_v62, %v1423_v1  ;;  %v1780_v37 = vadd.f32 %v3019_v45, %v1758_v17  ;;  %v1600_v18 = vmul.f32 %v2776_v23, %v1587_v25 }
 0x365   : > { %v1437_v20 = vmul.f32 %v2763_v51, %v1424_v43  ;;  %v1759_v16 = vadd.f32 %v1751_v61, %v3016_v13  ;;  %v1794_v41 = vmul.f32 %v3244_v2, %v1738_v58  ;;  %v1466_v56 = vadd.f32 %v3049_v12, %v1444_v50  ;;  %v1739_v61 = vld [vmem:[#allocation3 + $0x12] sm:$0xff] }
 0x366   : > { %v1480_v40 = vmul.f32 %v3153_v11, %v1424_v43  ;;  %v1530_v28 = vadd.f32 %v1522_v6, %v1508_v10  ;;  %v1670_v54 = vadd.f32 %v2986_v52, %v1648_v27  ;;  %v3260_v1 = vmul.f32 %v3201_v49, %v1587_v25 }
 0x367   : > { %v1509_v45 = vadd.f32 %v3055_v26, %v1487_v0  ;;  %v1649_v5 = vadd.f32 %v1641_v15, %v1627_v32  ;;  %v1445_v17 = vadd.f32 %v1437_v20, %v3038_v24  ;;  %v1523_v58 = vmul.f32 %v3232_v62, %v1424_v43 }
 0x368   : > { %v1488_v13 = vadd.f32 %v1480_v40, %v1466_v56  ;;  %v1802_v60 = vadd.f32 %v1794_v41, %v1780_v37  ;;  %v3266_v12 = vadd.f32 %v1600_v18, %v3029_v33  ;;  %v1438_v50 = vmul.f32 %v2763_v51, %v1425_v53 }
 0x369   : > { %v1642_v52 = vmul.f32 %v3201_v49, %v1586_v35  ;;  %v1781_v10 = vadd.f32 %v3080_v30, %v1759_v16  ;;  %v1531_v26 = vadd.f32 %v1523_v58, %v1509_v45  ;;  %v1628_v15 = vadd.f32 %v3067_v29, %v1606_v63  ;;  %v1740_v16 = vld [vmem:[#allocation3 + $0x1a] sm:$0xff]  ;;  %v1589_v45 = vld [vmem:[#allocation3 + $0x31] sm:$0xff] }
 0x36a   : > { %v1510_v27 = vadd.f32 %v3058_v31, %v1488_v13  ;;  %v1538_v24 = vmul.f32 %v2802_v4, %v1530_v28  ;;  %v1692_v0 = vadd.f32 %v1684_v3, %v1670_v54  ;;  %v1524_v43 = vmul.f32 %v3232_v62, %v1425_v53  ;;  %v1426_v28 = vld [vmem:[#allocation3 + $0x28] sm:$0xff] }
 0x36b   : > { %v1752_v32 = vmul.f32 %v3182_v14, %v1739_v61  ;;  %v1467_v33 = vadd.f32 %v3052_v38, %v1445_v17  ;;  %v1599_v6 = vmul.f32 %v2776_v23, %v1586_v35  ;;  %v1650_v37 = vadd.f32 %v1642_v52, %v1628_v15 }
 0x36c   : > { %v1671_v18 = vadd.f32 %v3070_v57, %v1649_v5  ;;  %v1824_v30 = vadd.f32 %v3086_v46, %v1802_v60  ;;  %v1446_v31 = vadd.f32 %v1438_v50, %v3046_v8  ;;  %v1481_v29 = vmul.f32 %v3153_v11, %v1425_v53  ;;  %v3559_v50 = vld [vmem:[#allocation28_spill] sm:$0xff] }
 0x36d   : > { %v1795_v4 = vmul.f32 %v3244_v2, %v1739_v61  ;;  %v1532_v63 = vadd.f32 %v1524_v43, %v1510_v27  ;;  %v1539_v3 = vmul.f32 %v2812_v19, %v1531_v26  ;;  %v1685_v20 = vmul.f32 %v2905_v7, %v1586_v35  ;;  %v3561_v26 = vld [vmem:[#allocation12_spill] sm:$0xff] }
 0x36e   : > { %v1760_v38 = vadd.f32 %v1752_v32, %v3073_v39  ;;  %v1700_v41 = vadd.f32 %v1692_v0, %v1538_v24  ;;  %v1686_v56 = vmul.f32 %v2905_v7, %v1587_v25  ;;  %v1838_v46 = vmul.f32 %v2945_v34, %v1739_v61  ;;  %v1588_v0 = vld [vmem:[#allocation3 + $0x29] sm:$0xff] }
 0x36f   : > { %v1803_v57 = vadd.f32 %v1795_v4, %v1781_v10  ;;  %v1489_v60 = vadd.f32 %v1481_v29, %v1467_v33  ;;  %v1607_v8 = vadd.f32 %v1599_v6, %v3061_v48  ;;  %v1672_v53 = vadd.f32 %v3035_v21, %v1650_v37  ;;  %v1427_v6 = vld [vmem:[#allocation3 + $0x30] sm:$0xff]  ;;  %v3563_v4 = vld [vmem:[#allocation36_spill] sm:$0xff] }
 0x370   : > { %v1693_v40 = vadd.f32 %v1685_v20, %v1671_v18  ;;  %v1753_v19 = vmul.f32 %v3182_v14, %v1740_v16  ;;  %v1839_v54 = vmul.f32 %v2945_v34, %v1740_v16  ;;  %v1846_v39 = vadd.f32 %v1838_v46, %v1824_v30  ;;  %v3564_v20 = vld [vmem:[#allocation30_spill] sm:$0xff]  ;;  %v3565_v46 = vld [vmem:[#allocation4_spill] sm:$0xff] }
 0x371   : > { %v1825_v35 = vadd.f32 %v3090_v47, %v1803_v57  ;;  %v1540_v25 = vmul.f32 %v2815_v22, %v1532_v63  ;;  %v1782_v17 = vadd.f32 %v3083_v59, %v1760_v38  ;;  %v1468_v13 = vadd.f32 %v3108_v9, %v1446_v31  ;;  %v3304_v22 = vld [vmem:[%s3462_s1 + $0x6] ss:$0 sm:$0xff]  ;;  %v3560_v9 = vld [vmem:[#allocation29_spill] sm:$0xff] }
 0x372   : > { %v1701_v5 = vadd.f32 %v1693_v40, %v1539_v3  ;;  %v1854_v21 = vmul.f32 %v2807_v55, %v1846_v39  ;;  %v1439_v58 = vmul.f32 %v2763_v51, %v1426_v28  ;;  %v1482_v61 = vmul.f32 %v3153_v11, %v1426_v28  ;;  %v3562_v31 = vld [vmem:[#allocation33_spill] sm:$0xff] }
 0x373   : > { %v1847_v48 = vadd.f32 %v1839_v54, %v1825_v35  ;;  %v1629_v47 = vadd.f32 %v3559_v50, %v1607_v8  ;;  %v1694_v52 = vadd.f32 %v1686_v56, %v1672_v53  ;;  %v1796_v10 = vmul.f32 %v3244_v2, %v1740_v16  ;;  %v1741_v3 = vld [vmem:[#allocation3 + $0x22] sm:$0xff] }
 0x374   : > { %v1602_v59 = vmul.f32 %v2776_v23, %v1589_v45  ;;  %v1761_v27 = vadd.f32 %v1753_v19, %v3560_v9  ;;  %v1862_v15 = vadd.f32 %v1854_v21, %v1700_v41  ;;  %v3310_v24 = vmul.f32 %v3201_v49, %v1589_v45  ;;  %v3573_v9 = vld [vmem:[#allocation41_spill] sm:$0xff] }
 0x375   : > { %v1855_v55 = vmul.f32 %v3561_v26, %v1847_v48  ;;  %v3312_v43 = vadd.f32 %v1694_v52, %v1540_v25  ;;  %v1804_v32 = vadd.f32 %v1796_v10, %v1782_v17  ;;  %v3315_v33 = vmul.f32 %v2905_v7, %v1589_v45  ;;  %v3568_v45 = vld [vmem:[#allocation5_spill] sm:$0xff]  ;;  %v3570_v48 = vld [vmem:[#allocation38_spill] sm:$0xff] }
 0x376   : > { %v1490_v37 = vadd.f32 %v1482_v61, %v1468_v13  ;;  %v1875_v30 = vadd.f32 %v3304_v22, %v1862_v15  ;;  %v1447_v29 = vadd.f32 %v1439_v58, %v3562_v31  ;;  %v1511_v63 = vadd.f32 %v3563_v4, %v1489_v60  ;;  %v3566_v60 = vld [vmem:[#allocation37_spill] sm:$0xff]  ;;  %v3571_v61 = vld [vmem:[#allocation40_spill] sm:$0xff]  ;;  %v3574_v15 = vld [vmem:[#allocation34_spill] sm:$0xff] }
 0x377   : > { %v1863_v18 = vadd.f32 %v1855_v55, %v1701_v5  ;;  %v3321_v16 = vadd.f32 %v1602_v59, %v3564_v20  ;;  %v1601_v38 = vmul.f32 %v2776_v23, %v1588_v0  ;;  %v1644_v41 = vmul.f32 %v3201_v49, %v1588_v0  ;;  %v1742_v59 = vld [vmem:[#allocation3 + $0x2a] sm:$0xff]  ;;  %v3575_v31 = vld [vmem:[#allocation45_spill] sm:$0xff] }
 0x378   : > { %v1651_v56 = vadd.f32 %v3260_v1, %v1629_v47  ;;  %v1883_v8 = vadd.f32 %v1875_v30, %v3565_v46  ;;  %v1440_v53 = vmul.f32 %v2763_v51, %v1427_v6  ;;  %v1525_v40 = vmul.f32 %v3232_v62, %v1426_v28  ;;  %v3567_v1 = vld [vmem:[#allocation39_spill] sm:$0xff]  ;;  %v3576_v4 = vld [vmem:[#allocation13_spill] sm:$0xff] }
 0x379   : > { %v1876_v57 = vadd.f32 %v3304_v22, %v1863_v18  ;;  %v1512_v19 = vadd.f32 %v3566_v60, %v1490_v37  ;;  %v1526_v35 = vmul.f32 %v3232_v62, %v1427_v6  ;;  %v1630_v54 = vadd.f32 %v3567_v1, %v3266_v12  ;;  %v3569_v28 = vld [vmem:[#allocation35_spill] sm:$0xff]  ;;  %v3580_v60 = vld [vmem:[#allocation46_spill] sm:$0xff]  ;;  %v3365_v1 = vld [vmem:[#allocation3 + $0x39] sm:$0xff] }
 0x37a   : > { %v1754_v39 = vmul.f32 %v3182_v14, %v1741_v3  ;;  %v1891_v5 = vadd.f32 %v1883_v8, %v1883_v8  ;;  %v1469_v17 = vadd.f32 %v3569_v28, %v1447_v29  ;;  %v1533_v13 = vadd.f32 %v1525_v40, %v1511_v63  ;;  %v3572_v47 = vld [vmem:[#allocation43_spill] sm:$0xff]  ;;  %v3579_v40 = vld [vmem:[#allocation44_spill] sm:$0xff] }
 0x37b   : > { %v1884_v25 = vadd.f32 %v1876_v57, %v3568_v45  ;;  %v1609_v21 = vadd.f32 %v1601_v38, %v3570_v48  ;;  %v1652_v58 = vadd.f32 %v1644_v41, %v1630_v54  ;;  %v1673_v50 = vadd.f32 %v3571_v61, %v1651_v56  ;;  %v1428_v38 = vld [vmem:[#allocation3 + $0x38] sm:$0xff]  ;;  %v3577_v41 = vld [vmem:[#allocation31_spill] sm:$0xff]  ;;  %v3581_v54 = vld [vmem:[#allocation14_spill] sm:$0xff] }
 0x37c   : > { %v1783_v52 = vadd.f32 %v3572_v47, %v1761_v27  ;;  %1899 = vst.msk [vmem:[%s3335_s21] sm:$0xff] %vm207_vm0, %v1891_v5  ;;  %v1483_v12 = vmul.f32 %v3153_v11, %v1427_v6  ;;  %v1762_v26 = vadd.f32 %v1754_v39, %v3573_v9  ;;  %v1797_v55 = vmul.f32 %v3244_v2, %v1741_v3  ;;  %v3578_v57 = vld [vmem:[#allocation32_spill] sm:$0xff]  ;;  %v1472_v61 = vld [vmem:[#allocation3 + $0x40] sm:$0xff]  ;;  %v3584_v47 = vld [vmem:[#allocation42_spill] sm:$0xff] }
 0x37d   : > { %v1892_v10 = vadd.f32 %v1884_v25, %v1884_v25  ;;  %v1448_v37 = vadd.f32 %v1440_v53, %v3574_v15  ;;  %v1534_v18 = vadd.f32 %v1526_v35, %v1512_v19  ;;  %v1687_v30 = vmul.f32 %v2905_v7, %v1588_v0  ;;  %v3582_v25 = vld [vmem:[#allocation53_spill] sm:$0xff] }
 0x37e   : > { %v1826_v29 = vadd.f32 %v3575_v31, %v1804_v32  ;;  %v1491_v27 = vadd.f32 %v1483_v12, %v1469_v17  ;;  %v1541_v63 = vmul.f32 %v3576_v4, %v1533_v13  ;;  %v1805_v20 = vadd.f32 %v1797_v55, %v1783_v52  ;;  %v3585_v12 = vld [vmem:[#allocation52_spill] sm:$0xff]  ;;  %v3588_v4 = vld [vmem:[#allocation57_spill] sm:$0xff] }
 0x37f   : > { %1900 = vst.msk [vmem:[%s3335_s21 + $0x8] sm:$0xff] %vm207_vm0, %v1892_v10  ;;  %v1840_v6 = vmul.f32 %v2945_v34, %v1741_v3  ;;  %v1631_v56 = vadd.f32 %v3577_v41, %v1609_v21  ;;  %v1674_v46 = vadd.f32 %v3578_v57, %v1652_v58  ;;  %v1695_v8 = vadd.f32 %v1687_v30, %v1673_v50  ;;  %v1516_v3 = vld [vmem:[#allocation3 + $0x48] sm:$0xff]  ;;  %v3583_v21 = vld [vmem:[#allocation15_spill] sm:$0xff]  ;;  %v3586_v55 = vld [vmem:[#allocation16_spill] sm:$0xff] }
 0x380   : > { %v1755_v53 = vmul.f32 %v3182_v14, %v1742_v59  ;;  %v1784_v0 = vadd.f32 %v3579_v40, %v1762_v26  ;;  %v1827_v32 = vadd.f32 %v3580_v60, %v1805_v20  ;;  %v1841_v19 = vmul.f32 %v2945_v34, %v1742_v59  ;;  %v1634_v10 = vld [vmem:[#allocation3 + $0x41] sm:$0xff] }
 0x381   : > { %v1848_v35 = vadd.f32 %v1840_v6, %v1826_v29  ;;  %v3368_v39 = vmul.f32 %v3581_v54, %v1534_v18  ;;  %v1441_v45 = vmul.f32 %v2763_v51, %v1428_v38  ;;  %v1470_v5 = vadd.f32 %v3582_v25, %v1448_v37  ;;  %v1788_v18 = vld [vmem:[#allocation3 + $0x42] sm:$0xff]  ;;  %v1744_v54 = vld [vmem:[#allocation3 + $0x3a] sm:$0xff]  ;;  %v3593_v25 = vld [vmem:[#allocation47_spill] sm:$0xff] }
 0x382   : > { %v1484_v28 = vmul.f32 %v3153_v11, %v1428_v38  ;;  %v1703_v17 = vadd.f32 %v1695_v8, %v1541_v63  ;;  %v1798_v13 = vmul.f32 %v3244_v2, %v1742_v59  ;;  %v1849_v48 = vadd.f32 %v1841_v19, %v1827_v32  ;;  %v3587_v30 = vld [vmem:[#allocation54_spill] sm:$0xff] }
 0x383   : > { %v1856_v58 = vmul.f32 %v3583_v21, %v1848_v35  ;;  %v3376_v50 = vadd.f32 %v3315_v33, %v1674_v46  ;;  %v1763_v52 = vadd.f32 %v1755_v53, %v3584_v47  ;;  %v1449_v9 = vadd.f32 %v1441_v45, %v3585_v12  ;;  %v3589_v46 = vld [vmem:[#allocation55_spill] sm:$0xff]  ;;  %v3590_v53 = vld [vmem:[#allocation48_spill] sm:$0xff]  ;;  %v3591_v60 = vld [vmem:[#allocation6_spill] sm:$0xff] }
 0x384   : > { %v1603_v51 = vmul.f32 %v2776_v23, %v3365_v1  ;;  %v1806_v26 = vadd.f32 %v1798_v13, %v1784_v0  ;;  %v1857_v15 = vmul.f32 %v3586_v55, %v1849_v48  ;;  %v1529_v37 = vmul.f32 %v3232_v62, %v1516_v3  ;;  %v1743_v0 = vld [vmem:[#allocation3 + $0x32] sm:$0xff]  ;;  %v3595_v21 = vld [vmem:[#allocation58_spill] sm:$0xff] }
 0x385   : > { %v1864_v59 = vadd.f32 %v1856_v58, %v3312_v43  ;;  %v1471_v31 = vadd.f32 %v3587_v30, %v1449_v9  ;;  %v1485_v33 = vmul.f32 %v3153_v11, %v1472_v61  ;;  %v1492_v29 = vadd.f32 %v1484_v28, %v1470_v5  ;;  %v3592_v3 = vld [vmem:[#allocation56_spill] sm:$0xff] }
 0x386   : > { %v1611_v63 = vadd.f32 %v1603_v51, %v3588_v4  ;;  %v1865_v20 = vadd.f32 %v1857_v15, %v1703_v17  ;;  %v1647_v23 = vmul.f32 %v3201_v49, %v1634_v10  ;;  %v1690_v41 = vmul.f32 %v2905_v7, %v1634_v10  ;;  %v3594_v17 = vld [vmem:[#allocation7_spill] sm:$0xff] }
 0x387   : > { %v1877_v6 = vadd.f32 %v3304_v22, %v1864_v59  ;;  %v1801_v57 = vmul.f32 %v3244_v2, %v1788_v18  ;;  %v1493_v43 = vadd.f32 %v1485_v33, %v1471_v31  ;;  %v1513_v8 = vadd.f32 %v3589_v46, %v1491_v27  ;;  %v3598_v31 = vld [vmem:[#allocation61_spill] sm:$0xff]  ;;  %v3603_v46 = vld [vmem:[#allocation18_spill] sm:$0xff] }
 0x388   : > { %v1633_v40 = vadd.f32 %v3590_v53, %v1611_v63  ;;  %v1878_v11 = vadd.f32 %v3304_v22, %v1865_v20  ;;  %v1844_v19 = vmul.f32 %v2945_v34, %v1788_v18  ;;  %v1646_v35 = vmul.f32 %v3201_v49, %v3365_v1  ;;  %v3597_v18 = vld [vmem:[#allocation59_spill] sm:$0xff] }
 0x389   : > { %v1885_v32 = vadd.f32 %v1877_v6, %v3591_v60  ;;  %v1514_v45 = vadd.f32 %v3592_v3, %v1492_v29  ;;  %v1515_v5 = vadd.f32 %v3593_v25, %v1493_v43  ;;  %v1527_v27 = vmul.f32 %v3232_v62, %v1428_v38  ;;  %v3599_v29 = vld [vmem:[#allocation17_spill] sm:$0xff]  ;;  %v3600_v63 = vld [vmem:[#allocation23_spill] sm:$0xff]  ;;  %v3605_v60 = vld [vmem:[#allocation62_spill] sm:$0xff] }
 0x38a   : > { %v1653_v28 = vadd.f32 %v3310_v24, %v1631_v56  ;;  %v1886_v13 = vadd.f32 %v1878_v11, %v3594_v17  ;;  %v1632_v58 = vadd.f32 %v3595_v21, %v3321_v16  ;;  %v1756_v47 = vmul.f32 %v3182_v14, %v1743_v0  ;;  %v3596_v24 = vld [vmem:[#allocation60_spill] sm:$0xff]  ;;  %v3602_v6 = vld [vmem:[#allocation49_spill] sm:$0xff] }
 0x38b   : > { %v1893_v48 = vadd.f32 %v1885_v32, %v1885_v32  ;;  %v1528_v49 = vmul.f32 %v3232_v62, %v1472_v61  ;;  %v1535_v10 = vadd.f32 %v1527_v27, %v1513_v8  ;;  %v1655_v12 = vadd.f32 %v1647_v23, %v1633_v40  ;;  %v3607_v25 = vld [vmem:[#allocation25_spill] sm:$0xff]  ;;  %v3609_v27 = vld [vmem:[#allocation19_spill] sm:$0xff] }
 0x38c   : > { %v1757_v9 = vmul.f32 %v3182_v14, %v1744_v54  ;;  %v1894_v51 = vadd.f32 %v1886_v13, %v1886_v13  ;;  %v1654_v38 = vadd.f32 %v1646_v35, %v1632_v58  ;;  %v1764_v56 = vadd.f32 %v1756_v47, %v3596_v24  ;;  %v3606_v35 = vld [vmem:[#allocation51_spill] sm:$0xff]  ;;  %v3614_v24 = vld [vmem:[#allocation8_spill] sm:$0xff] }
 0x38d   : > { %1901 = vst.msk [vmem:[%s3335_s21 + $0x10] sm:$0xff] %vm207_vm0, %v1893_v48  ;;  %v1785_v55 = vadd.f32 %v3218_v44, %v1763_v52  ;;  %v1536_v15 = vadd.f32 %v1528_v49, %v1514_v45  ;;  %v1537_v59 = vadd.f32 %v1529_v37, %v1515_v5  ;;  %v1675_v16 = vadd.f32 %v3597_v18, %v1653_v28  ;;  %v3601_v52 = vld [vmem:[#allocation50_spill] sm:$0xff]  ;;  %v3610_v58 = vld [vmem:[#allocation27_spill] sm:$0xff] }
 0x38e   : > { %v1765_v30 = vadd.f32 %v1757_v9, %v3212_v42  ;;  %1902 = vst.msk [vmem:[%s3335_s21 + $0x18] sm:$0xff] %vm207_vm0, %v1894_v51  ;;  %v1786_v62 = vadd.f32 %v3221_v36, %v1764_v56  ;;  %v1799_v14 = vmul.f32 %v3244_v2, %v1743_v0  ;;  %v1800_v61 = vmul.f32 %v3244_v2, %v1744_v54  ;;  %v3604_v2 = vld [vmem:[#allocation21_spill] sm:$0xff] }
 0x38f   : > { %v1828_v33 = vadd.f32 %v3598_v31, %v1806_v26  ;;  %v1543_v4 = vmul.f32 %v3599_v29, %v1535_v10  ;;  %v1677_v44 = vadd.f32 %v3600_v63, %v1655_v12  ;;  %v1842_v20 = vmul.f32 %v2945_v34, %v1743_v0  ;;  %v3611_v12 = vld [vmem:[#allocation20_spill] sm:$0xff] }
 0x390   : > { %v1787_v37 = vadd.f32 %v3601_v52, %v1765_v30  ;;  %v1676_v42 = vadd.f32 %v3602_v6, %v1654_v38  ;;  %v1689_v23 = vmul.f32 %v2905_v7, %v3365_v1  ;;  %v1807_v36 = vadd.f32 %v1799_v14, %v1785_v55  ;;  %v3608_v1 = vld [vmem:[#allocation26_spill] sm:$0xff] }
 0x391   : > { %v1808_v43 = vadd.f32 %v1800_v61, %v1786_v62  ;;  %v1544_v8 = vmul.f32 %v3603_v46, %v1536_v15  ;;  %v1545_v53 = vmul.f32 %v3604_v2, %v1537_v59  ;;  %v1850_v40 = vadd.f32 %v1842_v20, %v1828_v33  ;;  %v3616_v62 = vld [vmem:[#allocation10_spill] sm:$0xff]  ;;  %v3617_v61 = vld [vmem:[#allocation11_spill] sm:$0xff] }
 0x392   : > { %v1809_v26 = vadd.f32 %v1801_v57, %v1787_v37  ;;  %v1697_v11 = vadd.f32 %v1689_v23, %v1675_v16  ;;  %v1829_v32 = vadd.f32 %v3605_v60, %v1807_v36  ;;  %v1843_v0 = vmul.f32 %v2945_v34, %v1744_v54  ;;  %v3612_v54 = vld [vmem:[#allocation22_spill] sm:$0xff]  ;;  %v3615_v16 = vld [vmem:[#allocation9_spill] sm:$0xff] }
 0x393   : > { %v1830_v3 = vadd.f32 %v3606_v35, %v1808_v43  ;;  %v1704_v45 = vadd.f32 %v3376_v50, %v3368_v39  ;;  %v1699_v7 = vadd.f32 %v3607_v25, %v1677_v44  ;;  %v1858_v28 = vmul.f32 %v3609_v27, %v1850_v40  ;;  %v3613_v50 = vld [vmem:[#allocation24_spill] sm:$0xff] }
 0x394   : > { %v1831_v5 = vadd.f32 %v3608_v1, %v1809_v26  ;;  %v1698_v17 = vadd.f32 %v1690_v41, %v1676_v42  ;;  %v1705_v13 = vadd.f32 %v1697_v11, %v1543_v4  ;;  %v1851_v57 = vadd.f32 %v1843_v0, %v1829_v32 }
 0x395   : > { %v1852_v48 = vadd.f32 %v1844_v19, %v1830_v3  ;;  %v1707_v21 = vadd.f32 %v1699_v7, %v1545_v53  ;;  %v1866_v49 = vadd.f32 %v1858_v28, %v1704_v45 }
 0x396   : > { %v1853_v47 = vadd.f32 %v3610_v58, %v1831_v5  ;;  %v1706_v10 = vadd.f32 %v1698_v17, %v1544_v8  ;;  %v1859_v34 = vmul.f32 %v3611_v12, %v1851_v57 }
 0x397   : > { %v1860_v39 = vmul.f32 %v3612_v54, %v1852_v48  ;;  %v1879_v51 = vadd.f32 %v3304_v22, %v1866_v49 }
 0x398   : > { %v1861_v9 = vmul.f32 %v3613_v50, %v1853_v47  ;;  %v1867_v38 = vadd.f32 %v1859_v34, %v1705_v13 }
 0x399   : > { %v1868_v41 = vadd.f32 %v1860_v39, %v1706_v10  ;;  %v1887_v56 = vadd.f32 %v1879_v51, %v3614_v24 }
 0x39a   : > { %v1869_v19 = vadd.f32 %v1861_v9, %v1707_v21  ;;  %v1880_v55 = vadd.f32 %v3304_v22, %v1867_v38 }
 0x39b   : > { %v1881_v15 = vadd.f32 %v3304_v22, %v1868_v41  ;;  %v1895_v18 = vadd.f32 %v1887_v56, %v1887_v56 }
 0x39c   : > { %v1882_v59 = vadd.f32 %v3304_v22, %v1869_v19  ;;  %v1888_v30 = vadd.f32 %v1880_v55, %v3615_v16 }
 0x39d   : > { %v1889_v14 = vadd.f32 %v1881_v15, %v3616_v62  ;;  %1903 = vst.msk [vmem:[%s3335_s21 + $0x20] sm:$0xff] %vm207_vm0, %v1895_v18 }
 0x39e   : > { %v1890_v31 = vadd.f32 %v1882_v59, %v3617_v61  ;;  %v1896_v33 = vadd.f32 %v1888_v30, %v1888_v30 }
 0x39f   : > { %v1897_v29 = vadd.f32 %v1889_v14, %v1889_v14 }
 0x3a0   : > { %v1898_v4 = vadd.f32 %v1890_v31, %v1890_v31  ;;  %1904 = vst.msk [vmem:[%s3335_s21 + $0x28] sm:$0xff] %vm207_vm0, %v1896_v33 }
 0x3a1   : > { %1905 = vst.msk [vmem:[%s3335_s21 + $0x30] sm:$0xff] %vm207_vm0, %v1897_v29 }
 0x3a2   : > { %1906 = vst.msk [vmem:[%s3335_s21 + $0x38] sm:$0xff] %vm207_vm0, %v1898_v4 }
 0x3a3 PF: > { %s14_s15 = sadd.s32 1, %s2279_s15  }
 0x3a4   : > { %p11_p4 = scmp.ge.s32.totalorder %s14_s15, 4  }
 0x3a6   :  { %13 = sbr.rel (!%p11_p4) target bundleno = 1 (0x1), region = 70 }

</bundles_post_ra>
